<compile_context>
chip_gen: v5e
topology: v5e:2x2
jax: 0.10.0
libtpu: 0.0.40
codegen_flags: <defaults>
</compile_context>

<pallas_src>
import functools

import jax
import jax.numpy as jnp
from jax.experimental import pallas as pl
from jax.experimental.pallas import tpu as pltpu

# Explicit VMEM budget: safe on v5e/v6e (128 MiB phys) and v7x (64 MiB phys).
_VMEM_LIMIT = 32 * 1024 * 1024


def _pick_tile(dim, pref, quantum):
    """Largest tile <= pref that divides `dim` and is a multiple of `quantum`.

    Falls back to the full dim (a full-extent block is always legal w.r.t. the
    (8,128) constraint)."""
    if dim <= pref:
        return dim
    t = (pref // quantum) * quantum
    while t >= quantum:
        if dim % t == 0:
            return t
        t -= quantum
    return dim


# ----------------------------------------------------------------------------
# Fused linear:   y = [residual +] [QuickGELU]( [LayerNorm(x)] @ W + b )
# ----------------------------------------------------------------------------
def _fused_linear_kernel(*refs, act, fuse_ln, fuse_res, eps, nk):
    it = iter(refs)
    x_ref = next(it)
    w_ref = next(it)
    b_ref = next(it)
    g_ref = next(it) if fuse_ln else None
    bt_ref = next(it) if fuse_ln else None
    r_ref = next(it) if fuse_res else None
    o_ref = next(it)
    acc_ref = next(it) if nk > 1 else None

    x = x_ref[...]
    if fuse_ln:
        # LayerNorm statistics in f32 (fuse_ln implies the full K row is resident).
        xf = x.astype(jnp.float32)
        mu = jnp.mean(xf, axis=-1, keepdims=True)
        xc = xf - mu
        var = jnp.mean(xc * xc, axis=-1, keepdims=True)
        x = xc * jax.lax.rsqrt(var + eps) * g_ref[...] + bt_ref[...]

    # MXU matmul in bf16, f32 accumulation.
    part = jnp.dot(x.astype(jnp.bfloat16), w_ref[...].astype(jnp.bfloat16),
                   preferred_element_type=jnp.float32)

    def epilogue(acc):
        y = acc + b_ref[...]
        if act == "quickgelu":
            y = y * jax.nn.sigmoid(1.702 * y)   # CLIP QuickGELU (f32, EUP sigmoid)
        if fuse_res:
            y = y + r_ref[...].astype(jnp.float32)
        o_ref[...] = y.astype(o_ref.dtype)

    if nk == 1:
        epilogue(part)
    else:
        k = pl.program_id(2)

        @pl.when(k == 0)
        def _():
            acc_ref[...] = jnp.zeros_like(acc_ref)

        acc_ref[...] += part

        @pl.when(k == nk - 1)
        def _():
            epilogue(acc_ref[...])


def fused_linear_pallas(x, w, b=None, *, ln_g=None, ln_b=None, residual=None,
                        act=None, out_dtype=jnp.float32, eps=1e-5,
                        tm_pref=256, tn_pref=256, tk_pref=512):
    """x: [M, K], w: [K, N] (bf16 preferred), b: [N] or None -> [M, N] out_dtype.

    Optional fusions: LayerNorm over K applied to x (ln_g/ln_b), QuickGELU,
    residual add (residual: [M, N], added after bias/activation)."""
    M, K = x.shape
    Kw, N = w.shape
    assert Kw == K
    fuse_ln = ln_g is not None
    fuse_res = residual is not None

    if b is None:
        b = jnp.zeros((N,), jnp.float32)
    b2 = b.astype(jnp.float32).reshape(1, N)

    tm = _pick_tile(M, tm_pref, 8)
    tn = _pick_tile(N, tn_pref, 128)
    # LN needs the full feature row, so keep K un-tiled in that case.
    tk = K if fuse_ln else _pick_tile(K, tk_pref, 128)
    nk = K // tk
    grid = (M // tm, N // tn, nk)

    inputs = [x, w, b2]
    in_specs = [
        pl.BlockSpec((tm, tk), lambda i, j, k: (i, k)),
        pl.BlockSpec((tk, tn), lambda i, j, k: (k, j)),
        pl.BlockSpec((1, tn), lambda i, j, k: (0, j)),
    ]
    if fuse_ln:
        inputs += [ln_g.astype(jnp.float32).reshape(1, K),
                   ln_b.astype(jnp.float32).reshape(1, K)]
        in_specs += [pl.BlockSpec((1, tk), lambda i, j, k: (0, k)),
                     pl.BlockSpec((1, tk), lambda i, j, k: (0, k))]
    if fuse_res:
        inputs += [residual]
        # block index independent of k -> fetched once per (i, j), stays resident.
        in_specs += [pl.BlockSpec((tm, tn), lambda i, j, k: (i, j))]

    scratch = [pltpu.VMEM((tm, tn), jnp.float32)] if nk > 1 else []

    return pl.pallas_call(
        functools.partial(_fused_linear_kernel, act=act, fuse_ln=fuse_ln,
                          fuse_res=fuse_res, eps=eps, nk=nk),
        out_shape=jax.ShapeDtypeStruct((M, N), out_dtype),
        grid=grid,
        in_specs=in_specs,
        out_specs=pl.BlockSpec((tm, tn), lambda i, j, k: (i, j)),
        scratch_shapes=scratch,
        compiler_params=pltpu.CompilerParams(
            dimension_semantics=("parallel", "parallel", "arbitrary"),
            vmem_limit_bytes=_VMEM_LIMIT),
    )(*inputs)


# ----------------------------------------------------------------------------
# Row-tiled LayerNorm (used only for ln_pre; ln_1/ln_2 are fused into matmuls)
# ----------------------------------------------------------------------------
def _layernorm_kernel(x_ref, g_ref, b_ref, o_ref, *, eps):
    x = x_ref[...].astype(jnp.float32)
    mu = jnp.mean(x, axis=-1, keepdims=True)
    xc = x - mu
    var = jnp.mean(xc * xc, axis=-1, keepdims=True)
    o_ref[...] = (xc * jax.lax.rsqrt(var + eps) * g_ref[...] + b_ref[...]).astype(o_ref.dtype)


def layernorm_pallas(x, gamma, beta, eps=1e-5, tm_pref=512):
    M, D = x.shape
    tm = _pick_tile(M, tm_pref, 8)
    return pl.pallas_call(
        functools.partial(_layernorm_kernel, eps=eps),
        out_shape=jax.ShapeDtypeStruct((M, D), jnp.float32),
        grid=(M // tm,),
        in_specs=[pl.BlockSpec((tm, D), lambda i: (i, 0)),
                  pl.BlockSpec((1, D), lambda i: (0, 0)),
                  pl.BlockSpec((1, D), lambda i: (0, 0))],
        out_specs=pl.BlockSpec((tm, D), lambda i: (i, 0)),
        compiler_params=pltpu.CompilerParams(
            dimension_semantics=("parallel",),
            vmem_limit_bytes=_VMEM_LIMIT),
    )(x, gamma.astype(jnp.float32).reshape(1, D),
      beta.astype(jnp.float32).reshape(1, D))


# ----------------------------------------------------------------------------
# Multi-head attention: consumes packed QKV [B, S, 3D], heads sliced in-kernel
# ----------------------------------------------------------------------------
def _attention_kernel(qkv_ref, o_ref, *, heads, scale):
    qkv = qkv_ref[0]                      # [S, 3D] bf16, lane-dense load
    D = o_ref.shape[-1]
    Dh = D // heads
    outs = []
    # TODO(synk): for long sequences convert to a flash-style online softmax
    # with a KV grid axis instead of materializing the [S, S] score matrix.
    for h in range(heads):
        q = qkv[:, h * Dh:(h + 1) * Dh]
        k = qkv[:, D + h * Dh:D + (h + 1) * Dh]
        v = qkv[:, 2 * D + h * Dh:2 * D + (h + 1) * Dh]
        # q @ k^T via dot_general (no explicit transpose), f32 scores.
        s = jax.lax.dot_general(q, k, (((1,), (1,)), ((), ())),
                                preferred_element_type=jnp.float32) * scale
        m = jnp.max(s, axis=-1, keepdims=True)
        p = jnp.exp(s - m)
        p = p * pl.reciprocal(jnp.sum(p, axis=-1, keepdims=True), approx=True)
        outs.append(jnp.dot(p.astype(jnp.bfloat16), v,
                            preferred_element_type=jnp.float32))
    # single lane-dense store of all heads
    o_ref[0] = jnp.concatenate(outs, axis=-1).astype(o_ref.dtype)


def attention_pallas(qkv, heads):
    """qkv: [B, S, 3D] bf16 (Q|K|V packed, heads packed inside each D) -> [B, S, D] bf16."""
    B, S, threeD = qkv.shape
    D = threeD // 3
    Dh = D // heads
    scale = 1.0 / (Dh ** 0.5)
    return pl.pallas_call(
        functools.partial(_attention_kernel, heads=heads, scale=scale),
        out_shape=jax.ShapeDtypeStruct((B, S, D), jnp.bfloat16),
        grid=(B,),
        in_specs=[pl.BlockSpec((1, S, threeD), lambda b: (b, 0, 0))],
        out_specs=pl.BlockSpec((1, S, D), lambda b: (b, 0, 0)),
        compiler_params=pltpu.CompilerParams(
            dimension_semantics=("parallel",),
            vmem_limit_bytes=_VMEM_LIMIT),
    )(qkv)


# ----------------------------------------------------------------------------
# Model (residual stream kept in f32; matmul operands bf16)
# ----------------------------------------------------------------------------
def residual_attention_block(x, p, heads):
    """CLIP ResidualAttentionBlock:  x += MHA(ln_1(x));  x += MLP(ln_2(x))."""
    B, S, D = x.shape
    x2 = x.reshape(B * S, D)

    # --- attention sub-block: ln_1 fused into the QKV projection ---
    qkv = fused_linear_pallas(x2, p["w_in"], p["b_in"],
                              ln_g=p["ln1_g"], ln_b=p["ln1_b"],
                              out_dtype=jnp.bfloat16)            # [B*S, 3D]
    a = attention_pallas(qkv.reshape(B, S, 3 * D), heads)         # [B, S, D] bf16
    # out-projection with the residual add fused into the epilogue
    x2 = fused_linear_pallas(a.reshape(B * S, D), p["w_out"], p["b_out"],
                             residual=x2, out_dtype=jnp.float32)

    # --- MLP sub-block: ln_2 fused into fc1 (+QuickGELU), residual into fc2 ---
    h = fused_linear_pallas(x2, p["w_fc1"], p["b_fc1"],
                            ln_g=p["ln2_g"], ln_b=p["ln2_b"],
                            act="quickgelu", out_dtype=jnp.bfloat16)
    x2 = fused_linear_pallas(h, p["w_fc2"], p["b_fc2"],
                             residual=x2, out_dtype=jnp.float32)
    return x2.reshape(B, S, D)


def _layernorm_jnp(v, g, b, eps=1e-5):
    mu = jnp.mean(v, axis=-1, keepdims=True)
    vc = v - mu
    var = jnp.mean(vc * vc, axis=-1, keepdims=True)
    return vc * jax.lax.rsqrt(var + eps) * g + b


def image_encoder_forward(x_nchw, params):
    """Mirrors ImageEncoder.forward.  x_nchw: [B, C, H, W] float32."""
    B, C, H, W = x_nchw.shape
    P = params["patch"]
    D = params["width"]
    nH, nW = H // P, W // P
    Np = nH * nW

    # conv1 (kernel == stride, no bias)  ==  patchify + matmul on the MXU
    patches = (x_nchw.reshape(B, C, nH, P, nW, P)
               .transpose(0, 2, 4, 1, 3, 5)              # [B, nH, nW, C, P, P]
               .reshape(B * Np, C * P * P)).astype(jnp.bfloat16)
    x = fused_linear_pallas(patches, params["conv_w"],
                            out_dtype=jnp.float32).reshape(B, Np, D)

    # prepend class token, add positional embedding (tiny, plain JAX glue)
    cls = jnp.broadcast_to(params["class_embedding"][None, None, :], (B, 1, D))
    x = jnp.concatenate([cls, x], axis=1)                 # [B, S, D]
    S = Np + 1
    x = x + params["positional_embedding"][None]

    # ln_pre (row-tiled Pallas LayerNorm)
    x = layernorm_pallas(x.reshape(B * S, D), params["ln_pre_g"],
                         params["ln_pre_b"]).reshape(B, S, D)

    # transformer resblocks, collecting low-level features
    low_feats = []
    for i, blk in enumerate(params["blocks"]):
        x = residual_attention_block(x, blk, params["heads"])
        if i + 1 in params["low_level_idx"]:
            low_feats.append(x)

    # tail ops only touch [B, D] rows -> pallas launch overhead dominates; plain JAX
    cls_tok = _layernorm_jnp(x[:, 0, :], params["ln_post_g"], params["ln_post_b"])
    out = cls_tok @ params["proj"]

    low_cls = []
    for i, feat in enumerate(low_feats):
        f = _layernorm_jnp(feat[:, 0, :], params["low_ln_g"][i], params["low_ln_b"][i])
        low_cls.append(f @ params["proj_low"][i])

    if len(params["low_level_idx"]) != 0:
        return out, low_cls
    return out


# ----------------------------------------------------------------------------
# Deterministic parameter init (synthetic; shapes mirror the module __init__)
# ----------------------------------------------------------------------------
def init_params(key, *, width, heads, layers, patch, in_chans, seq_len,
                output_dim, low_level_idx):
    n_keys = 4 + 4 * layers + len(low_level_idx) + 4
    ks = iter(jax.random.split(key, n_keys))
    D = width
    scale = D ** (-0.5)

    def nrm(shape, s=0.02, dtype=jnp.float32):
        return (s * jax.random.normal(next(ks), shape)).astype(dtype)

    params = {
        "width": D, "heads": heads, "patch": patch,
        "low_level_idx": list(low_level_idx),
        # conv1 weight stored pre-flattened as [C*P*P, D] and in bf16 (MXU operand)
        "conv_w": nrm((in_chans * patch * patch, D), dtype=jnp.bfloat16),
        "class_embedding": nrm((D,), s=scale),
        "positional_embedding": nrm((seq_len, D), s=scale),
        "ln_pre_g": jnp.ones((D,), jnp.float32),
        "ln_pre_b": jnp.zeros((D,), jnp.float32),
        "ln_post_g": jnp.ones((D,), jnp.float32),
        "ln_post_b": jnp.zeros((D,), jnp.float32),
        "proj": nrm((D, output_dim), s=scale),
        "blocks": [], "low_ln_g": [], "low_ln_b": [], "proj_low": [],
    }
    for _ in range(layers):
        params["blocks"].append({
            "ln1_g": jnp.ones((D,), jnp.float32), "ln1_b": jnp.zeros((D,), jnp.float32),
            "w_in": nrm((D, 3 * D), dtype=jnp.bfloat16),
            "b_in": jnp.zeros((3 * D,), jnp.float32),
            "w_out": nrm((D, D), dtype=jnp.bfloat16),
            "b_out": jnp.zeros((D,), jnp.float32),
            "ln2_g": jnp.ones((D,), jnp.float32), "ln2_b": jnp.zeros((D,), jnp.float32),
            "w_fc1": nrm((D, 4 * D), dtype=jnp.bfloat16),
            "b_fc1": jnp.zeros((4 * D,), jnp.float32),
            "w_fc2": nrm((4 * D, D), dtype=jnp.bfloat16),
            "b_fc2": jnp.zeros((D,), jnp.float32),
        })
    for _ in range(len(low_level_idx)):
        params["low_ln_g"].append(jnp.ones((D,), jnp.float32))
        params["low_ln_b"].append(jnp.zeros((D,), jnp.float32))
        params["proj_low"].append(nrm((D, output_dim), s=scale))
    return params


# ----------------------------------------------------------------------------
if __name__ == "__main__":
    # Small, forward-consistent shapes: 16x16 image, 4x4 patches -> 16 patches,
    # seq = 17, width = 32, 4 heads, 3 transformer blocks, output_dim = 16,
    # low-level features taken after blocks 1 and 2.
    B, C, H, W = 2, 3, 16, 16
    PATCH, WIDTH, HEADS, LAYERS, OUT_DIM = 4, 32, 4, 3, 16
    LOW_IDX = [1, 2]
    SEQ = (H // PATCH) * (W // PATCH) + 1

    x = jax.random.normal(jax.random.PRNGKey(0), (B, C, H, W), dtype=jnp.float32)
    params = init_params(
        jax.random.PRNGKey(1), width=WIDTH, heads=HEADS, layers=LAYERS,
        patch=PATCH, in_chans=C, seq_len=SEQ, output_dim=OUT_DIM,
        low_level_idx=LOW_IDX)

    fwd = jax.jit(lambda inp: image_encoder_forward(inp, params))
    out, low_cls = fwd(x)
    jax.block_until_ready(out)
    for f in low_cls:
        jax.block_until_ready(f)

    assert out.shape == (B, OUT_DIM)
    assert len(low_cls) == len(LOW_IDX)
    assert all(f.shape == (B, OUT_DIM) for f in low_cls)
    print("KERNEL_OK")
</pallas_src>

<mosaic_0001>
module attributes {stable_mosaic.version = 11 : i64} {
  func.func @_fused_linear_kernel(%arg0: i32, %arg1: i32, %arg2: i32, %arg3: memref<32x48xbf16, #tpu.memory_space<vmem>>, %arg4: memref<48x32xbf16, #tpu.memory_space<vmem>>, %arg5: memref<1x32xf32, #tpu.memory_space<vmem>>, %arg6: memref<32x32xf32, #tpu.memory_space<vmem>>) attributes {dimension_semantics = [#tpu.dimension_semantics<parallel>, #tpu.dimension_semantics<parallel>, #tpu.dimension_semantics<arbitrary>], iteration_bounds = array<i64: 1, 1, 1>, scalar_prefetch = 0 : i64, scratch_operands = 0 : i64, tpu.core_type = #tpu.core_type<tc>, window_params = [{transform_indices = @transform_0, window_bounds = array<i64: 32, 48>}, {transform_indices = @transform_1, window_bounds = array<i64: 48, 32>}, {transform_indices = @transform_2, window_bounds = array<i64: 1, 32>}, {transform_indices = @transform_3, window_bounds = array<i64: 32, 32>}]} {
    %c0 = arith.constant 0 : index
    %c0_0 = arith.constant 0 : index
    %0 = vector.load %arg3[%c0, %c0_0] : memref<32x48xbf16, #tpu.memory_space<vmem>>, vector<32x48xbf16>
    %c0_1 = arith.constant 0 : index
    %c0_2 = arith.constant 0 : index
    %1 = vector.load %arg4[%c0_1, %c0_2] : memref<48x32xbf16, #tpu.memory_space<vmem>>, vector<48x32xbf16>
    %cst = arith.constant dense<0.000000e+00> : vector<32x32xf32>
    %2 = tpu.matmul %0, %1, %cst {dimension_numbers = #tpu.dot_dimension_numbers<[1], [0], [0], [1], [0, 0, 1, 1], [], []>} : vector<32x48xbf16>, vector<48x32xbf16>, vector<32x32xf32> -> vector<32x32xf32>
    %c0_3 = arith.constant 0 : index
    %c0_4 = arith.constant 0 : index
    %3 = vector.load %arg5[%c0_3, %c0_4] : memref<1x32xf32, #tpu.memory_space<vmem>>, vector<1x32xf32>
    %4 = vector.broadcast %3 : vector<1x32xf32> to vector<32x32xf32>
    %5 = arith.addf %2, %4 : vector<32x32xf32>
    %c0_5 = arith.constant 0 : index
    %c0_6 = arith.constant 0 : index
    %6 = vector.load %arg6[%c0_5, %c0_6] : memref<32x32xf32, #tpu.memory_space<vmem>>, vector<32x32xf32>
    tpu.vector_store %arg6[%c0_5, %c0_6], %5 {strides = array<i32>} : memref<32x32xf32, #tpu.memory_space<vmem>>, vector<32x32xf32>,
    return
  }
  func.func @transform_0(%arg0: i32, %arg1: i32, %arg2: i32) -> (i32, i32) {
    %c0_i32 = arith.constant 0 : i32
    return %arg0, %arg2 : i32, i32
  }
  func.func @transform_1(%arg0: i32, %arg1: i32, %arg2: i32) -> (i32, i32) {
    %c0_i32 = arith.constant 0 : i32
    return %arg2, %arg1 : i32, i32
  }
  func.func @transform_2(%arg0: i32, %arg1: i32, %arg2: i32) -> (i32, i32) {
    %c0_i32 = arith.constant 0 : i32
    %c0_i32_0 = arith.constant 0 : i32
    return %c0_i32, %arg1 : i32, i32
  }
  func.func @transform_3(%arg0: i32, %arg1: i32, %arg2: i32) -> (i32, i32) {
    %c0_i32 = arith.constant 0 : i32
    return %arg0, %arg1 : i32, i32
  }
}

module attributes {stable_mosaic.version = 11 : i64} {
  func.func @_attention_kernel(%arg0: i32, %arg1: memref<1x17x96xbf16, #tpu.memory_space<vmem>>, %arg2: memref<1x17x32xbf16, #tpu.memory_space<vmem>>) attributes {dimension_semantics = [#tpu.dimension_semantics<parallel>], iteration_bounds = array<i64: 2>, scalar_prefetch = 0 : i64, scratch_operands = 0 : i64, tpu.core_type = #tpu.core_type<tc>, window_params = [{transform_indices = @transform_0, window_bounds = array<i64: 1, 17, 96>}, {transform_indices = @transform_1, window_bounds = array<i64: 1, 17, 32>}]} {
    %c0 = arith.constant 0 : index
    %c0_0 = arith.constant 0 : index
    %c0_1 = arith.constant 0 : index
    %0 = vector.load %arg1[%c0, %c0_0, %c0_1] : memref<1x17x96xbf16, #tpu.memory_space<vmem>>, vector<1x17x96xbf16>
    %1 = vector.shape_cast %0 : vector<1x17x96xbf16> to vector<17x96xbf16>
    %2 = vector.extract_strided_slice %1 {offsets = [0, 0], sizes = [17, 8], strides = [1, 1]} : vector<17x96xbf16> to vector<17x8xbf16>
    %3 = vector.extract_strided_slice %1 {offsets = [0, 32], sizes = [17, 8], strides = [1, 1]} : vector<17x96xbf16> to vector<17x8xbf16>
    %4 = vector.extract_strided_slice %1 {offsets = [0, 64], sizes = [17, 8], strides = [1, 1]} : vector<17x96xbf16> to vector<17x8xbf16>
    %cst = arith.constant dense<0.000000e+00> : vector<17x17xf32>
    %5 = tpu.matmul %2, %3, %cst {dimension_numbers = #tpu.dot_dimension_numbers<[1], [1], [0], [0], [0, 0, 1, 0], [], []>} : vector<17x8xbf16>, vector<17x8xbf16>, vector<17x17xf32> -> vector<17x17xf32>
    %cst_2 = arith.constant 0.353553385 : f32
    %6 = vector.broadcast %cst_2 : f32 to vector<17x17xf32>
    %7 = arith.mulf %5, %6 : vector<17x17xf32>
    %cst_3 = arith.constant dense<0xFF800000> : vector<17xf32>
    %8 = vector.multi_reduction <maximumf>, %7, %cst_3 [1] : vector<17x17xf32> to vector<17xf32>
    %9 = vector.shape_cast %8 : vector<17xf32> to vector<17x1xf32>
    %10 = vector.broadcast %9 : vector<17x1xf32> to vector<17x17xf32>
    %11 = arith.subf %7, %10 : vector<17x17xf32>
    %12 = math.exp %11 : vector<17x17xf32>
    %cst_4 = arith.constant dense<0.000000e+00> : vector<17xf32>
    %13 = vector.multi_reduction <add>, %12, %cst_4 [1] : vector<17x17xf32> to vector<17xf32>
    %14 = vector.shape_cast %13 : vector<17xf32> to vector<17x1xf32>
    %15 = tpu.reciprocal %14 {approx = true} : vector<17x1xf32> -> vector<17x1xf32>
    %16 = vector.broadcast %15 : vector<17x1xf32> to vector<17x17xf32>
    %17 = arith.mulf %12, %16 : vector<17x17xf32>
    %18 = arith.truncf %17 : vector<17x17xf32> to vector<17x17xbf16>
    %cst_5 = arith.constant dense<0.000000e+00> : vector<17x8xf32>
    %19 = tpu.matmul %18, %4, %cst_5 {dimension_numbers = #tpu.dot_dimension_numbers<[1], [0], [0], [1], [0, 0, 1, 1], [], []>} : vector<17x17xbf16>, vector<17x8xbf16>, vector<17x8xf32> -> vector<17x8xf32>
    %20 = vector.extract_strided_slice %1 {offsets = [0, 8], sizes = [17, 8], strides = [1, 1]} : vector<17x96xbf16> to vector<17x8xbf16>
    %21 = vector.extract_strided_slice %1 {offsets = [0, 40], sizes = [17, 8], strides = [1, 1]} : vector<17x96xbf16> to vector<17x8xbf16>
    %22 = vector.extract_strided_slice %1 {offsets = [0, 72], sizes = [17, 8], strides = [1, 1]} : vector<17x96xbf16> to vector<17x8xbf16>
    %cst_6 = arith.constant dense<0.000000e+00> : vector<17x17xf32>
    %23 = tpu.matmul %20, %21, %cst_6 {dimension_numbers = #tpu.dot_dimension_numbers<[1], [1], [0], [0], [0, 0, 1, 0], [], []>} : vector<17x8xbf16>, vector<17x8xbf16>, vector<17x17xf32> -> vector<17x17xf32>
    %cst_7 = arith.constant 0.353553385 : f32
    %24 = vector.broadcast %cst_7 : f32 to vector<17x17xf32>
    %25 = arith.mulf %23, %24 : vector<17x17xf32>
    %cst_8 = arith.constant dense<0xFF800000> : vector<17xf32>
    %26 = vector.multi_reduction <maximumf>, %25, %cst_8 [1] : vector<17x17xf32> to vector<17xf32>
    %27 = vector.shape_cast %26 : vector<17xf32> to vector<17x1xf32>
    %28 = vector.broadcast %27 : vector<17x1xf32> to vector<17x17xf32>
    %29 = arith.subf %25, %28 : vector<17x17xf32>
    %30 = math.exp %29 : vector<17x17xf32>
    %cst_9 = arith.constant dense<0.000000e+00> : vector<17xf32>
    %31 = vector.multi_reduction <add>, %30, %cst_9 [1] : vector<17x17xf32> to vector<17xf32>
    %32 = vector.shape_cast %31 : vector<17xf32> to vector<17x1xf32>
    %33 = tpu.reciprocal %32 {approx = true} : vector<17x1xf32> -> vector<17x1xf32>
    %34 = vector.broadcast %33 : vector<17x1xf32> to vector<17x17xf32>
    %35 = arith.mulf %30, %34 : vector<17x17xf32>
    %36 = arith.truncf %35 : vector<17x17xf32> to vector<17x17xbf16>
    %cst_10 = arith.constant dense<0.000000e+00> : vector<17x8xf32>
    %37 = tpu.matmul %36, %22, %cst_10 {dimension_numbers = #tpu.dot_dimension_numbers<[1], [0], [0], [1], [0, 0, 1, 1], [], []>} : vector<17x17xbf16>, vector<17x8xbf16>, vector<17x8xf32> -> vector<17x8xf32>
    %38 = vector.extract_strided_slice %1 {offsets = [0, 16], sizes = [17, 8], strides = [1, 1]} : vector<17x96xbf16> to vector<17x8xbf16>
    %39 = vector.extract_strided_slice %1 {offsets = [0, 48], sizes = [17, 8], strides = [1, 1]} : vector<17x96xbf16> to vector<17x8xbf16>
    %40 = vector.extract_strided_slice %1 {offsets = [0, 80], sizes = [17, 8], strides = [1, 1]} : vector<17x96xbf16> to vector<17x8xbf16>
    %cst_11 = arith.constant dense<0.000000e+00> : vector<17x17xf32>
    %41 = tpu.matmul %38, %39, %cst_11 {dimension_numbers = #tpu.dot_dimension_numbers<[1], [1], [0], [0], [0, 0, 1, 0], [], []>} : vector<17x8xbf16>, vector<17x8xbf16>, vector<17x17xf32> -> vector<17x17xf32>
    %cst_12 = arith.constant 0.353553385 : f32
    %42 = vector.broadcast %cst_12 : f32 to vector<17x17xf32>
    %43 = arith.mulf %41, %42 : vector<17x17xf32>
    %cst_13 = arith.constant dense<0xFF800000> : vector<17xf32>
    %44 = vector.multi_reduction <maximumf>, %43, %cst_13 [1] : vector<17x17xf32> to vector<17xf32>
    %45 = vector.shape_cast %44 : vector<17xf32> to vector<17x1xf32>
    %46 = vector.broadcast %45 : vector<17x1xf32> to vector<17x17xf32>
    %47 = arith.subf %43, %46 : vector<17x17xf32>
    %48 = math.exp %47 : vector<17x17xf32>
    %cst_14 = arith.constant dense<0.000000e+00> : vector<17xf32>
    %49 = vector.multi_reduction <add>, %48, %cst_14 [1] : vector<17x17xf32> to vector<17xf32>
    %50 = vector.shape_cast %49 : vector<17xf32> to vector<17x1xf32>
    %51 = tpu.reciprocal %50 {approx = true} : vector<17x1xf32> -> vector<17x1xf32>
    %52 = vector.broadcast %51 : vector<17x1xf32> to vector<17x17xf32>
    %53 = arith.mulf %48, %52 : vector<17x17xf32>
    %54 = arith.truncf %53 : vector<17x17xf32> to vector<17x17xbf16>
    %cst_15 = arith.constant dense<0.000000e+00> : vector<17x8xf32>
    %55 = tpu.matmul %54, %40, %cst_15 {dimension_numbers = #tpu.dot_dimension_numbers<[1], [0], [0], [1], [0, 0, 1, 1], [], []>} : vector<17x17xbf16>, vector<17x8xbf16>, vector<17x8xf32> -> vector<17x8xf32>
    %56 = vector.extract_strided_slice %1 {offsets = [0, 24], sizes = [17, 8], strides = [1, 1]} : vector<17x96xbf16> to vector<17x8xbf16>
    %57 = vector.extract_strided_slice %1 {offsets = [0, 56], sizes = [17, 8], strides = [1, 1]} : vector<17x96xbf16> to vector<17x8xbf16>
    %58 = vector.extract_strided_slice %1 {offsets = [0, 88], sizes = [17, 8], strides = [1, 1]} : vector<17x96xbf16> to vector<17x8xbf16>
    %cst_16 = arith.constant dense<0.000000e+00> : vector<17x17xf32>
    %59 = tpu.matmul %56, %57, %cst_16 {dimension_numbers = #tpu.dot_dimension_numbers<[1], [1], [0], [0], [0, 0, 1, 0], [], []>} : vector<17x8xbf16>, vector<17x8xbf16>, vector<17x17xf32> -> vector<17x17xf32>
    %cst_17 = arith.constant 0.353553385 : f32
    %60 = vector.broadcast %cst_17 : f32 to vector<17x17xf32>
    %61 = arith.mulf %59, %60 : vector<17x17xf32>
    %cst_18 = arith.constant dense<0xFF800000> : vector<17xf32>
    %62 = vector.multi_reduction <maximumf>, %61, %cst_18 [1] : vector<17x17xf32> to vector<17xf32>
    %63 = vector.shape_cast %62 : vector<17xf32> to vector<17x1xf32>
    %64 = vector.broadcast %63 : vector<17x1xf32> to vector<17x17xf32>
    %65 = arith.subf %61, %64 : vector<17x17xf32>
    %66 = math.exp %65 : vector<17x17xf32>
    %cst_19 = arith.constant dense<0.000000e+00> : vector<17xf32>
    %67 = vector.multi_reduction <add>, %66, %cst_19 [1] : vector<17x17xf32> to vector<17xf32>
    %68 = vector.shape_cast %67 : vector<17xf32> to vector<17x1xf32>
    %69 = tpu.reciprocal %68 {approx = true} : vector<17x1xf32> -> vector<17x1xf32>
    %70 = vector.broadcast %69 : vector<17x1xf32> to vector<17x17xf32>
    %71 = arith.mulf %66, %70 : vector<17x17xf32>
    %72 = arith.truncf %71 : vector<17x17xf32> to vector<17x17xbf16>
    %cst_20 = arith.constant dense<0.000000e+00> : vector<17x8xf32>
    %73 = tpu.matmul %72, %58, %cst_20 {dimension_numbers = #tpu.dot_dimension_numbers<[1], [0], [0], [1], [0, 0, 1, 1], [], []>} : vector<17x17xbf16>, vector<17x8xbf16>, vector<17x8xf32> -> vector<17x8xf32>
    %74 = tpu.concatenate %19, %37, %55, %73 in 1 : vector<17x8xf32>, vector<17x8xf32>, vector<17x8xf32>, vector<17x8xf32> -> vector<17x32xf32>
    %75 = arith.truncf %74 : vector<17x32xf32> to vector<17x32xbf16>
    %c0_21 = arith.constant 0 : index
    %c0_22 = arith.constant 0 : index
    %c0_23 = arith.constant 0 : index
    %76 = vector.load %arg2[%c0_21, %c0_22, %c0_23] : memref<1x17x32xbf16, #tpu.memory_space<vmem>>, vector<1x17x32xbf16>
    %77 = vector.shape_cast %76 : vector<1x17x32xbf16> to vector<17x32xbf16>
    %78 = vector.shape_cast %75 : vector<17x32xbf16> to vector<1x17x32xbf16>
    tpu.vector_store %arg2[%c0_21, %c0_22, %c0_23], %78 {strides = array<i32>} : memref<1x17x32xbf16, #tpu.memory_space<vmem>>, vector<1x17x32xbf16>,
    return
  }
  func.func @transform_0(%arg0: i32) -> (i32, i32, i32) {
    %c0_i32 = arith.constant 0 : i32
    %c0_i32_0 = arith.constant 0 : i32
    %c0_i32_1 = arith.constant 0 : i32
    return %arg0, %c0_i32, %c0_i32_0 : i32, i32, i32
  }
  func.func @transform_1(%arg0: i32) -> (i32, i32, i32) {
    %c0_i32 = arith.constant 0 : i32
    %c0_i32_0 = arith.constant 0 : i32
    %c0_i32_1 = arith.constant 0 : i32
    return %arg0, %c0_i32, %c0_i32_0 : i32, i32, i32
  }
}

module attributes {stable_mosaic.version = 11 : i64} {
  func.func @_fused_linear_kernel(%arg0: i32, %arg1: i32, %arg2: i32, %arg3: memref<34x32xf32, #tpu.memory_space<vmem>>, %arg4: memref<32x96xbf16, #tpu.memory_space<vmem>>, %arg5: memref<1x96xf32, #tpu.memory_space<vmem>>, %arg6: memref<1x32xf32, #tpu.memory_space<vmem>>, %arg7: memref<1x32xf32, #tpu.memory_space<vmem>>, %arg8: memref<34x96xbf16, #tpu.memory_space<vmem>>) attributes {dimension_semantics = [#tpu.dimension_semantics<parallel>, #tpu.dimension_semantics<parallel>, #tpu.dimension_semantics<arbitrary>], iteration_bounds = array<i64: 1, 1, 1>, scalar_prefetch = 0 : i64, scratch_operands = 0 : i64, tpu.core_type = #tpu.core_type<tc>, window_params = [{transform_indices = @transform_0, window_bounds = array<i64: 34, 32>}, {transform_indices = @transform_1, window_bounds = array<i64: 32, 96>}, {transform_indices = @transform_2, window_bounds = array<i64: 1, 96>}, {transform_indices = @transform_3, window_bounds = array<i64: 1, 32>}, {transform_indices = @transform_4, window_bounds = array<i64: 1, 32>}, {transform_indices = @transform_5, window_bounds = array<i64: 34, 96>}]} {
    %c0 = arith.constant 0 : index
    %c0_0 = arith.constant 0 : index
    %0 = vector.load %arg3[%c0, %c0_0] : memref<34x32xf32, #tpu.memory_space<vmem>>, vector<34x32xf32>
    %cst = arith.constant dense<0.000000e+00> : vector<34xf32>
    %1 = vector.multi_reduction <add>, %0, %cst [1] : vector<34x32xf32> to vector<34xf32>
    %2 = vector.shape_cast %1 : vector<34xf32> to vector<34x1xf32>
    %cst_1 = arith.constant 3.200000e+01 : f32
    %3 = vector.broadcast %cst_1 : f32 to vector<34x1xf32>
    %4 = arith.divf %2, %3 : vector<34x1xf32>
    %5 = vector.broadcast %4 : vector<34x1xf32> to vector<34x32xf32>
    %6 = arith.subf %0, %5 : vector<34x32xf32>
    %7 = arith.mulf %6, %6 : vector<34x32xf32>
    %cst_2 = arith.constant dense<0.000000e+00> : vector<34xf32>
    %8 = vector.multi_reduction <add>, %7, %cst_2 [1] : vector<34x32xf32> to vector<34xf32>
    %9 = vector.shape_cast %8 : vector<34xf32> to vector<34x1xf32>
    %cst_3 = arith.constant 3.200000e+01 : f32
    %10 = vector.broadcast %cst_3 : f32 to vector<34x1xf32>
    %11 = arith.divf %9, %10 : vector<34x1xf32>
    %cst_4 = arith.constant 9.99999974E-6 : f32
    %12 = vector.broadcast %cst_4 : f32 to vector<34x1xf32>
    %13 = arith.addf %11, %12 : vector<34x1xf32>
    %14 = math.rsqrt %13 : vector<34x1xf32>
    %15 = vector.broadcast %14 : vector<34x1xf32> to vector<34x32xf32>
    %16 = arith.mulf %6, %15 : vector<34x32xf32>
    %c0_5 = arith.constant 0 : index
    %c0_6 = arith.constant 0 : index
    %17 = vector.load %arg6[%c0_5, %c0_6] : memref<1x32xf32, #tpu.memory_space<vmem>>, vector<1x32xf32>
    %18 = vector.broadcast %17 : vector<1x32xf32> to vector<34x32xf32>
    %19 = arith.mulf %16, %18 : vector<34x32xf32>
    %c0_7 = arith.constant 0 : index
    %c0_8 = arith.constant 0 : index
    %20 = vector.load %arg7[%c0_7, %c0_8] : memref<1x32xf32, #tpu.memory_space<vmem>>, vector<1x32xf32>
    %21 = vector.broadcast %20 : vector<1x32xf32> to vector<34x32xf32>
    %22 = arith.addf %19, %21 : vector<34x32xf32>
    %23 = arith.truncf %22 : vector<34x32xf32> to vector<34x32xbf16>
    %c0_9 = arith.constant 0 : index
    %c0_10 = arith.constant 0 : index
    %24 = vector.load %arg4[%c0_9, %c0_10] : memref<32x96xbf16, #tpu.memory_space<vmem>>, vector<32x96xbf16>
    %cst_11 = arith.constant dense<0.000000e+00> : vector<34x96xf32>
    %25 = tpu.matmul %23, %24, %cst_11 {dimension_numbers = #tpu.dot_dimension_numbers<[1], [0], [0], [1], [0, 0, 1, 1], [], []>} : vector<34x32xbf16>, vector<32x96xbf16>, vector<34x96xf32> -> vector<34x96xf32>
    %c0_12 = arith.constant 0 : index
    %c0_13 = arith.constant 0 : index
    %26 = vector.load %arg5[%c0_12, %c0_13] : memref<1x96xf32, #tpu.memory_space<vmem>>, vector<1x96xf32>
    %27 = vector.broadcast %26 : vector<1x96xf32> to vector<34x96xf32>
    %28 = arith.addf %25, %27 : vector<34x96xf32>
    %29 = arith.truncf %28 : vector<34x96xf32> to vector<34x96xbf16>
    %c0_14 = arith.constant 0 : index
    %c0_15 = arith.constant 0 : index
    %30 = vector.load %arg8[%c0_14, %c0_15] : memref<34x96xbf16, #tpu.memory_space<vmem>>, vector<34x96xbf16>
    tpu.vector_store %arg8[%c0_14, %c0_15], %29 {strides = array<i32>} : memref<34x96xbf16, #tpu.memory_space<vmem>>, vector<34x96xbf16>,
    return
  }
  func.func @transform_0(%arg0: i32, %arg1: i32, %arg2: i32) -> (i32, i32) {
    %c0_i32 = arith.constant 0 : i32
    return %arg0, %arg2 : i32, i32
  }
  func.func @transform_1(%arg0: i32, %arg1: i32, %arg2: i32) -> (i32, i32) {
    %c0_i32 = arith.constant 0 : i32
    return %arg2, %arg1 : i32, i32
  }
  func.func @transform_2(%arg0: i32, %arg1: i32, %arg2: i32) -> (i32, i32) {
    %c0_i32 = arith.constant 0 : i32
    %c0_i32_0 = arith.constant 0 : i32
    return %c0_i32, %arg1 : i32, i32
  }
  func.func @transform_3(%arg0: i32, %arg1: i32, %arg2: i32) -> (i32, i32) {
    %c0_i32 = arith.constant 0 : i32
    %c0_i32_0 = arith.constant 0 : i32
    return %c0_i32, %arg2 : i32, i32
  }
  func.func @transform_4(%arg0: i32, %arg1: i32, %arg2: i32) -> (i32, i32) {
    %c0_i32 = arith.constant 0 : i32
    %c0_i32_0 = arith.constant 0 : i32
    return %c0_i32, %arg2 : i32, i32
  }
  func.func @transform_5(%arg0: i32, %arg1: i32, %arg2: i32) -> (i32, i32) {
    %c0_i32 = arith.constant 0 : i32
    return %arg0, %arg1 : i32, i32
  }
}

module attributes {stable_mosaic.version = 11 : i64} {
  func.func @_layernorm_kernel(%arg0: i32, %arg1: memref<34x32xf32, #tpu.memory_space<vmem>>, %arg2: memref<1x32xf32, #tpu.memory_space<vmem>>, %arg3: memref<1x32xf32, #tpu.memory_space<vmem>>, %arg4: memref<34x32xf32, #tpu.memory_space<vmem>>) attributes {dimension_semantics = [#tpu.dimension_semantics<parallel>], iteration_bounds = array<i64: 1>, scalar_prefetch = 0 : i64, scratch_operands = 0 : i64, tpu.core_type = #tpu.core_type<tc>, window_params = [{transform_indices = @transform_0, window_bounds = array<i64: 34, 32>}, {pipeline_mode = #tpu.pipeline_mode<synchronous>, transform_indices = @transform_1, window_bounds = array<i64: 1, 32>}, {pipeline_mode = #tpu.pipeline_mode<synchronous>, transform_indices = @transform_2, window_bounds = array<i64: 1, 32>}, {transform_indices = @transform_3, window_bounds = array<i64: 34, 32>}]} {
    %c0 = arith.constant 0 : index
    %c0_0 = arith.constant 0 : index
    %0 = vector.load %arg1[%c0, %c0_0] : memref<34x32xf32, #tpu.memory_space<vmem>>, vector<34x32xf32>
    %cst = arith.constant dense<0.000000e+00> : vector<34xf32>
    %1 = vector.multi_reduction <add>, %0, %cst [1] : vector<34x32xf32> to vector<34xf32>
    %2 = vector.shape_cast %1 : vector<34xf32> to vector<34x1xf32>
    %cst_1 = arith.constant 3.200000e+01 : f32
    %3 = vector.broadcast %cst_1 : f32 to vector<34x1xf32>
    %4 = arith.divf %2, %3 : vector<34x1xf32>
    %5 = vector.broadcast %4 : vector<34x1xf32> to vector<34x32xf32>
    %6 = arith.subf %0, %5 : vector<34x32xf32>
    %7 = arith.mulf %6, %6 : vector<34x32xf32>
    %cst_2 = arith.constant dense<0.000000e+00> : vector<34xf32>
    %8 = vector.multi_reduction <add>, %7, %cst_2 [1] : vector<34x32xf32> to vector<34xf32>
    %9 = vector.shape_cast %8 : vector<34xf32> to vector<34x1xf32>
    %cst_3 = arith.constant 3.200000e+01 : f32
    %10 = vector.broadcast %cst_3 : f32 to vector<34x1xf32>
    %11 = arith.divf %9, %10 : vector<34x1xf32>
    %cst_4 = arith.constant 9.99999974E-6 : f32
    %12 = vector.broadcast %cst_4 : f32 to vector<34x1xf32>
    %13 = arith.addf %11, %12 : vector<34x1xf32>
    %14 = math.rsqrt %13 : vector<34x1xf32>
    %15 = vector.broadcast %14 : vector<34x1xf32> to vector<34x32xf32>
    %16 = arith.mulf %6, %15 : vector<34x32xf32>
    %c0_5 = arith.constant 0 : index
    %c0_6 = arith.constant 0 : index
    %17 = vector.load %arg2[%c0_5, %c0_6] : memref<1x32xf32, #tpu.memory_space<vmem>>, vector<1x32xf32>
    %18 = vector.broadcast %17 : vector<1x32xf32> to vector<34x32xf32>
    %19 = arith.mulf %16, %18 : vector<34x32xf32>
    %c0_7 = arith.constant 0 : index
    %c0_8 = arith.constant 0 : index
    %20 = vector.load %arg3[%c0_7, %c0_8] : memref<1x32xf32, #tpu.memory_space<vmem>>, vector<1x32xf32>
    %21 = vector.broadcast %20 : vector<1x32xf32> to vector<34x32xf32>
    %22 = arith.addf %19, %21 : vector<34x32xf32>
    %c0_9 = arith.constant 0 : index
    %c0_10 = arith.constant 0 : index
    %23 = vector.load %arg4[%c0_9, %c0_10] : memref<34x32xf32, #tpu.memory_space<vmem>>, vector<34x32xf32>
    tpu.vector_store %arg4[%c0_9, %c0_10], %22 {strides = array<i32>} : memref<34x32xf32, #tpu.memory_space<vmem>>, vector<34x32xf32>,
    return
  }
  func.func @transform_0(%arg0: i32) -> (i32, i32) {
    %c0_i32 = arith.constant 0 : i32
    %c0_i32_0 = arith.constant 0 : i32
    return %arg0, %c0_i32 : i32, i32
  }
  func.func @transform_1(%arg0: i32) -> (i32, i32) {
    %c0_i32 = arith.constant 0 : i32
    %c0_i32_0 = arith.constant 0 : i32
    %c0_i32_1 = arith.constant 0 : i32
    return %c0_i32, %c0_i32_0 : i32, i32
  }
  func.func @transform_2(%arg0: i32) -> (i32, i32) {
    %c0_i32 = arith.constant 0 : i32
    %c0_i32_0 = arith.constant 0 : i32
    %c0_i32_1 = arith.constant 0 : i32
    return %c0_i32, %c0_i32_0 : i32, i32
  }
  func.func @transform_3(%arg0: i32) -> (i32, i32) {
    %c0_i32 = arith.constant 0 : i32
    %c0_i32_0 = arith.constant 0 : i32
    return %arg0, %c0_i32 : i32, i32
  }
}

module attributes {stable_mosaic.version = 11 : i64} {
  func.func @_fused_linear_kernel(%arg0: i32, %arg1: i32, %arg2: i32, %arg3: memref<34x32xbf16, #tpu.memory_space<vmem>>, %arg4: memref<32x32xbf16, #tpu.memory_space<vmem>>, %arg5: memref<1x32xf32, #tpu.memory_space<vmem>>, %arg6: memref<34x32xf32, #tpu.memory_space<vmem>>, %arg7: memref<34x32xf32, #tpu.memory_space<vmem>>) attributes {dimension_semantics = [#tpu.dimension_semantics<parallel>, #tpu.dimension_semantics<parallel>, #tpu.dimension_semantics<arbitrary>], iteration_bounds = array<i64: 1, 1, 1>, scalar_prefetch = 0 : i64, scratch_operands = 0 : i64, tpu.core_type = #tpu.core_type<tc>, window_params = [{transform_indices = @transform_0, window_bounds = array<i64: 34, 32>}, {transform_indices = @transform_1, window_bounds = array<i64: 32, 32>}, {transform_indices = @transform_2, window_bounds = array<i64: 1, 32>}, {transform_indices = @transform_3, window_bounds = array<i64: 34, 32>}, {transform_indices = @transform_4, window_bounds = array<i64: 34, 32>}]} {
    %c0 = arith.constant 0 : index
    %c0_0 = arith.constant 0 : index
    %0 = vector.load %arg3[%c0, %c0_0] : memref<34x32xbf16, #tpu.memory_space<vmem>>, vector<34x32xbf16>
    %c0_1 = arith.constant 0 : index
    %c0_2 = arith.constant 0 : index
    %1 = vector.load %arg4[%c0_1, %c0_2] : memref<32x32xbf16, #tpu.memory_space<vmem>>, vector<32x32xbf16>
    %cst = arith.constant dense<0.000000e+00> : vector<34x32xf32>
    %2 = tpu.matmul %0, %1, %cst {dimension_numbers = #tpu.dot_dimension_numbers<[1], [0], [0], [1], [0, 0, 1, 1], [], []>} : vector<34x32xbf16>, vector<32x32xbf16>, vector<34x32xf32> -> vector<34x32xf32>
    %c0_3 = arith.constant 0 : index
    %c0_4 = arith.constant 0 : index
    %3 = vector.load %arg5[%c0_3, %c0_4] : memref<1x32xf32, #tpu.memory_space<vmem>>, vector<1x32xf32>
    %4 = vector.broadcast %3 : vector<1x32xf32> to vector<34x32xf32>
    %5 = arith.addf %2, %4 : vector<34x32xf32>
    %c0_5 = arith.constant 0 : index
    %c0_6 = arith.constant 0 : index
    %6 = vector.load %arg6[%c0_5, %c0_6] : memref<34x32xf32, #tpu.memory_space<vmem>>, vector<34x32xf32>
    %7 = arith.addf %5, %6 : vector<34x32xf32>
    %c0_7 = arith.constant 0 : index
    %c0_8 = arith.constant 0 : index
    %8 = vector.load %arg7[%c0_7, %c0_8] : memref<34x32xf32, #tpu.memory_space<vmem>>, vector<34x32xf32>
    tpu.vector_store %arg7[%c0_7, %c0_8], %7 {strides = array<i32>} : memref<34x32xf32, #tpu.memory_space<vmem>>, vector<34x32xf32>,
    return
  }
  func.func @transform_0(%arg0: i32, %arg1: i32, %arg2: i32) -> (i32, i32) {
    %c0_i32 = arith.constant 0 : i32
    return %arg0, %arg2 : i32, i32
  }
  func.func @transform_1(%arg0: i32, %arg1: i32, %arg2: i32) -> (i32, i32) {
    %c0_i32 = arith.constant 0 : i32
    return %arg2, %arg1 : i32, i32
  }
  func.func @transform_2(%arg0: i32, %arg1: i32, %arg2: i32) -> (i32, i32) {
    %c0_i32 = arith.constant 0 : i32
    %c0_i32_0 = arith.constant 0 : i32
    return %c0_i32, %arg1 : i32, i32
  }
  func.func @transform_3(%arg0: i32, %arg1: i32, %arg2: i32) -> (i32, i32) {
    %c0_i32 = arith.constant 0 : i32
    return %arg0, %arg1 : i32, i32
  }
  func.func @transform_4(%arg0: i32, %arg1: i32, %arg2: i32) -> (i32, i32) {
    %c0_i32 = arith.constant 0 : i32
    return %arg0, %arg1 : i32, i32
  }
}

module attributes {stable_mosaic.version = 11 : i64} {
  func.func @_fused_linear_kernel(%arg0: i32, %arg1: i32, %arg2: i32, %arg3: memref<34x32xf32, #tpu.memory_space<vmem>>, %arg4: memref<32x128xbf16, #tpu.memory_space<vmem>>, %arg5: memref<1x128xf32, #tpu.memory_space<vmem>>, %arg6: memref<1x32xf32, #tpu.memory_space<vmem>>, %arg7: memref<1x32xf32, #tpu.memory_space<vmem>>, %arg8: memref<34x128xbf16, #tpu.memory_space<vmem>>) attributes {dimension_semantics = [#tpu.dimension_semantics<parallel>, #tpu.dimension_semantics<parallel>, #tpu.dimension_semantics<arbitrary>], iteration_bounds = array<i64: 1, 1, 1>, scalar_prefetch = 0 : i64, scratch_operands = 0 : i64, tpu.core_type = #tpu.core_type<tc>, window_params = [{transform_indices = @transform_0, window_bounds = array<i64: 34, 32>}, {transform_indices = @transform_1, window_bounds = array<i64: 32, 128>}, {transform_indices = @transform_2, window_bounds = array<i64: 1, 128>}, {transform_indices = @transform_3, window_bounds = array<i64: 1, 32>}, {transform_indices = @transform_4, window_bounds = array<i64: 1, 32>}, {transform_indices = @transform_5, window_bounds = array<i64: 34, 128>}]} {
    %c0 = arith.constant 0 : index
    %c0_0 = arith.constant 0 : index
    %0 = vector.load %arg3[%c0, %c0_0] : memref<34x32xf32, #tpu.memory_space<vmem>>, vector<34x32xf32>
    %cst = arith.constant dense<0.000000e+00> : vector<34xf32>
    %1 = vector.multi_reduction <add>, %0, %cst [1] : vector<34x32xf32> to vector<34xf32>
    %2 = vector.shape_cast %1 : vector<34xf32> to vector<34x1xf32>
    %cst_1 = arith.constant 3.200000e+01 : f32
    %3 = vector.broadcast %cst_1 : f32 to vector<34x1xf32>
    %4 = arith.divf %2, %3 : vector<34x1xf32>
    %5 = vector.broadcast %4 : vector<34x1xf32> to vector<34x32xf32>
    %6 = arith.subf %0, %5 : vector<34x32xf32>
    %7 = arith.mulf %6, %6 : vector<34x32xf32>
    %cst_2 = arith.constant dense<0.000000e+00> : vector<34xf32>
    %8 = vector.multi_reduction <add>, %7, %cst_2 [1] : vector<34x32xf32> to vector<34xf32>
    %9 = vector.shape_cast %8 : vector<34xf32> to vector<34x1xf32>
    %cst_3 = arith.constant 3.200000e+01 : f32
    %10 = vector.broadcast %cst_3 : f32 to vector<34x1xf32>
    %11 = arith.divf %9, %10 : vector<34x1xf32>
    %cst_4 = arith.constant 9.99999974E-6 : f32
    %12 = vector.broadcast %cst_4 : f32 to vector<34x1xf32>
    %13 = arith.addf %11, %12 : vector<34x1xf32>
    %14 = math.rsqrt %13 : vector<34x1xf32>
    %15 = vector.broadcast %14 : vector<34x1xf32> to vector<34x32xf32>
    %16 = arith.mulf %6, %15 : vector<34x32xf32>
    %c0_5 = arith.constant 0 : index
    %c0_6 = arith.constant 0 : index
    %17 = vector.load %arg6[%c0_5, %c0_6] : memref<1x32xf32, #tpu.memory_space<vmem>>, vector<1x32xf32>
    %18 = vector.broadcast %17 : vector<1x32xf32> to vector<34x32xf32>
    %19 = arith.mulf %16, %18 : vector<34x32xf32>
    %c0_7 = arith.constant 0 : index
    %c0_8 = arith.constant 0 : index
    %20 = vector.load %arg7[%c0_7, %c0_8] : memref<1x32xf32, #tpu.memory_space<vmem>>, vector<1x32xf32>
    %21 = vector.broadcast %20 : vector<1x32xf32> to vector<34x32xf32>
    %22 = arith.addf %19, %21 : vector<34x32xf32>
    %23 = arith.truncf %22 : vector<34x32xf32> to vector<34x32xbf16>
    %c0_9 = arith.constant 0 : index
    %c0_10 = arith.constant 0 : index
    %24 = vector.load %arg4[%c0_9, %c0_10] : memref<32x128xbf16, #tpu.memory_space<vmem>>, vector<32x128xbf16>
    %cst_11 = arith.constant dense<0.000000e+00> : vector<34x128xf32>
    %25 = tpu.matmul %23, %24, %cst_11 {dimension_numbers = #tpu.dot_dimension_numbers<[1], [0], [0], [1], [0, 0, 1, 1], [], []>} : vector<34x32xbf16>, vector<32x128xbf16>, vector<34x128xf32> -> vector<34x128xf32>
    %c0_12 = arith.constant 0 : index
    %c0_13 = arith.constant 0 : index
    %26 = vector.load %arg5[%c0_12, %c0_13] : memref<1x128xf32, #tpu.memory_space<vmem>>, vector<1x128xf32>
    %27 = vector.broadcast %26 : vector<1x128xf32> to vector<34x128xf32>
    %28 = arith.addf %25, %27 : vector<34x128xf32>
    %cst_14 = arith.constant 1.702000e+00 : f32
    %29 = vector.broadcast %cst_14 : f32 to vector<34x128xf32>
    %30 = arith.mulf %29, %28 : vector<34x128xf32>
    %31 = arith.negf %30 : vector<34x128xf32>
    %32 = math.exp %31 : vector<34x128xf32>
    %cst_15 = arith.constant 1.000000e+00 : f32
    %33 = vector.broadcast %cst_15 : f32 to vector<34x128xf32>
    %34 = arith.addf %33, %32 : vector<34x128xf32>
    %35 = arith.divf %33, %34 : vector<34x128xf32>
    %36 = arith.mulf %28, %35 : vector<34x128xf32>
    %37 = arith.truncf %36 : vector<34x128xf32> to vector<34x128xbf16>
    %c0_16 = arith.constant 0 : index
    %c0_17 = arith.constant 0 : index
    %38 = vector.load %arg8[%c0_16, %c0_17] : memref<34x128xbf16, #tpu.memory_space<vmem>>, vector<34x128xbf16>
    tpu.vector_store %arg8[%c0_16, %c0_17], %37 {strides = array<i32>} : memref<34x128xbf16, #tpu.memory_space<vmem>>, vector<34x128xbf16>,
    return
  }
  func.func @transform_0(%arg0: i32, %arg1: i32, %arg2: i32) -> (i32, i32) {
    %c0_i32 = arith.constant 0 : i32
    return %arg0, %arg2 : i32, i32
  }
  func.func @transform_1(%arg0: i32, %arg1: i32, %arg2: i32) -> (i32, i32) {
    %c0_i32 = arith.constant 0 : i32
    return %arg2, %arg1 : i32, i32
  }
  func.func @transform_2(%arg0: i32, %arg1: i32, %arg2: i32) -> (i32, i32) {
    %c0_i32 = arith.constant 0 : i32
    %c0_i32_0 = arith.constant 0 : i32
    return %c0_i32, %arg1 : i32, i32
  }
  func.func @transform_3(%arg0: i32, %arg1: i32, %arg2: i32) -> (i32, i32) {
    %c0_i32 = arith.constant 0 : i32
    %c0_i32_0 = arith.constant 0 : i32
    return %c0_i32, %arg2 : i32, i32
  }
  func.func @transform_4(%arg0: i32, %arg1: i32, %arg2: i32) -> (i32, i32) {
    %c0_i32 = arith.constant 0 : i32
    %c0_i32_0 = arith.constant 0 : i32
    return %c0_i32, %arg2 : i32, i32
  }
  func.func @transform_5(%arg0: i32, %arg1: i32, %arg2: i32) -> (i32, i32) {
    %c0_i32 = arith.constant 0 : i32
    return %arg0, %arg1 : i32, i32
  }
}

module attributes {stable_mosaic.version = 11 : i64} {
  func.func @_fused_linear_kernel(%arg0: i32, %arg1: i32, %arg2: i32, %arg3: memref<34x128xbf16, #tpu.memory_space<vmem>>, %arg4: memref<128x32xbf16, #tpu.memory_space<vmem>>, %arg5: memref<1x32xf32, #tpu.memory_space<vmem>>, %arg6: memref<34x32xf32, #tpu.memory_space<vmem>>, %arg7: memref<34x32xf32, #tpu.memory_space<vmem>>) attributes {dimension_semantics = [#tpu.dimension_semantics<parallel>, #tpu.dimension_semantics<parallel>, #tpu.dimension_semantics<arbitrary>], iteration_bounds = array<i64: 1, 1, 1>, scalar_prefetch = 0 : i64, scratch_operands = 0 : i64, tpu.core_type = #tpu.core_type<tc>, window_params = [{transform_indices = @transform_0, window_bounds = array<i64: 34, 128>}, {transform_indices = @transform_1, window_bounds = array<i64: 128, 32>}, {transform_indices = @transform_2, window_bounds = array<i64: 1, 32>}, {transform_indices = @transform_3, window_bounds = array<i64: 34, 32>}, {transform_indices = @transform_4, window_bounds = array<i64: 34, 32>}]} {
    %c0 = arith.constant 0 : index
    %c0_0 = arith.constant 0 : index
    %0 = vector.load %arg3[%c0, %c0_0] : memref<34x128xbf16, #tpu.memory_space<vmem>>, vector<34x128xbf16>
    %c0_1 = arith.constant 0 : index
    %c0_2 = arith.constant 0 : index
    %1 = vector.load %arg4[%c0_1, %c0_2] : memref<128x32xbf16, #tpu.memory_space<vmem>>, vector<128x32xbf16>
    %cst = arith.constant dense<0.000000e+00> : vector<34x32xf32>
    %2 = tpu.matmul %0, %1, %cst {dimension_numbers = #tpu.dot_dimension_numbers<[1], [0], [0], [1], [0, 0, 1, 1], [], []>} : vector<34x128xbf16>, vector<128x32xbf16>, vector<34x32xf32> -> vector<34x32xf32>
    %c0_3 = arith.constant 0 : index
    %c0_4 = arith.constant 0 : index
    %3 = vector.load %arg5[%c0_3, %c0_4] : memref<1x32xf32, #tpu.memory_space<vmem>>, vector<1x32xf32>
    %4 = vector.broadcast %3 : vector<1x32xf32> to vector<34x32xf32>
    %5 = arith.addf %2, %4 : vector<34x32xf32>
    %c0_5 = arith.constant 0 : index
    %c0_6 = arith.constant 0 : index
    %6 = vector.load %arg6[%c0_5, %c0_6] : memref<34x32xf32, #tpu.memory_space<vmem>>, vector<34x32xf32>
    %7 = arith.addf %5, %6 : vector<34x32xf32>
    %c0_7 = arith.constant 0 : index
    %c0_8 = arith.constant 0 : index
    %8 = vector.load %arg7[%c0_7, %c0_8] : memref<34x32xf32, #tpu.memory_space<vmem>>, vector<34x32xf32>
    tpu.vector_store %arg7[%c0_7, %c0_8], %7 {strides = array<i32>} : memref<34x32xf32, #tpu.memory_space<vmem>>, vector<34x32xf32>,
    return
  }
  func.func @transform_0(%arg0: i32, %arg1: i32, %arg2: i32) -> (i32, i32) {
    %c0_i32 = arith.constant 0 : i32
    return %arg0, %arg2 : i32, i32
  }
  func.func @transform_1(%arg0: i32, %arg1: i32, %arg2: i32) -> (i32, i32) {
    %c0_i32 = arith.constant 0 : i32
    return %arg2, %arg1 : i32, i32
  }
  func.func @transform_2(%arg0: i32, %arg1: i32, %arg2: i32) -> (i32, i32) {
    %c0_i32 = arith.constant 0 : i32
    %c0_i32_0 = arith.constant 0 : i32
    return %c0_i32, %arg1 : i32, i32
  }
  func.func @transform_3(%arg0: i32, %arg1: i32, %arg2: i32) -> (i32, i32) {
    %c0_i32 = arith.constant 0 : i32
    return %arg0, %arg1 : i32, i32
  }
  func.func @transform_4(%arg0: i32, %arg1: i32, %arg2: i32) -> (i32, i32) {
    %c0_i32 = arith.constant 0 : i32
    return %arg0, %arg1 : i32, i32
  }
}

</mosaic_0001>

<bundles_post_ra>
// kernel: _lambda_.17
= control target key start
LH: loop header
LB: loop body
LE: loop exit
PB: predicated region body
PF: predicated region fallthrough
CT: control target
= control target key end

     0   :  { %vm57_vm0 = vcmask 392192   ;;  %vm83_vm1 = vcmask 261120   ;;  %s173_s1 = inlined_call_operand.vmem [shape: bf16[48,32], index: 1, kind: input, shape index: {}]   ;;  %s174_s2 = inlined_call_operand.vmem [shape: f32[1,32], index: 2, kind: input, shape index: {}]   ;;  %s175_s0 = inlined_call_operand.vmem [shape: bf16[32,48], index: 0, kind: input, shape index: {}]   ;;  %s176_s3 = inlined_call_operand.vmem [shape: f32[32,32], index: 3, kind: output, shape index: {}]  }
   0x1   :  { %v118_v0 = vld [vmem:[%s173_s1 + $0x10] sm:$0xff]  ;;  %v117_v1 = vld [vmem:[%s173_s1 + $0x8] sm:$0xff]  ;;  %v116_v2 = vld [vmem:[%s173_s1] sm:$0xff] }
   0x2   :  { %69 = vmatpush.bf16.msra.mxu0 %v118_v0  ;;  %119 = vmatpush.bf16.msra.mxu1 %v118_v0  ;;  %v114_v3 = vld [vmem:[%s175_s0] sm:$0xff]  ;;  %v115_v4 = vld [vmem:[%s175_s0 + $0x8] sm:$0xff] }
   0x3   :  { %v122_v5 = vld [vmem:[%s174_s2] ss:$0 sm:$0xff] }
   0x6   :  { %70 = vmatpush.bf16.msra.mxu0 %v117_v1  ;;  %120 = vmatpush.bf16.msra.mxu1 %v117_v1 }
   0xa   :  { %71 = vmatpush.bf16.msra.mxu0 %v116_v2  ;;  %121 = vmatpush.bf16.msra.mxu1 %v116_v2 }
   0xd   :  { %112 = vmatmul.msk.bf16.vlgmr.msra.gmra.mxu0 %vm57_vm0, %v114_v3  ;;  %113 = vmatmul.msk.bf16.vlgmr.msra.gmra.mxu1 %vm57_vm0, %v115_v4 }
  0x8a   :  { %v73_v6 = vpop.f32.mrf.mxu0  ;;  %v78_v7 = vpop.f32.mrf.mxu1 }
  0x8b   :  { %v74_v8 = vadd.f32 %v122_v5, %v73_v6  ;;  %v79_v9 = vadd.f32 %v122_v5, %v78_v7 }
  0x8d   :  { %84 = vst.msk [vmem:[%s176_s3] sm:$0xff] %vm83_vm1, %v74_v8 }
  0x8e   :  { %86 = vst.msk [vmem:[%s176_s3 + $0x10] sm:$0xff] %vm83_vm1, %v79_v9 }
  0x92   :  { %v75_v10 = vpop.f32.mrf.mxu0  ;;  %v80_v11 = vpop.f32.mrf.mxu1 }
  0x93   :  { %v76_v12 = vadd.f32 %v122_v5, %v75_v10  ;;  %v81_v13 = vadd.f32 %v122_v5, %v80_v11 }
  0x95   :  { %85 = vst.msk [vmem:[%s176_s3 + $0x8] sm:$0xff] %vm83_vm1, %v76_v12 }
  0x96   :  { %87 = vst.msk [vmem:[%s176_s3 + $0x18] sm:$0xff] %vm83_vm1, %v81_v13 }

// kernel: _lambda_.19
= control target key start
LH: loop header
LB: loop body
LE: loop exit
PB: predicated region body
PF: predicated region fallthrough
CT: control target
= control target key end

     0   :  { %vm39_vm0 = vcmask 254976   ;;  %vm26_vm1 = vcmask 261120   ;;  %v267_v10 = vmov 32.0   ;;  %s393_s0 = inlined_call_operand.vmem [shape: f32[34,32], index: 0, kind: input, shape index: {}]   ;;  %s394_s3 = inlined_call_operand.vmem [shape: f32[1,32], index: 3, kind: input, shape index: {}]   ;;  %s395_s4 = inlined_call_operand.vmem [shape: f32[1,32], index: 4, kind: input, shape index: {}]   ;;  %s396_s2 = inlined_call_operand.vmem [shape: f32[1,96], index: 2, kind: input, shape index: {}]   ;;  %s397_s1 = inlined_call_operand.vmem [shape: bf16[32,96], index: 1, kind: input, shape index: {}]   ;;  %s398_s5 = inlined_call_operand.vmem [shape: bf16[34,96], index: 5, kind: output, shape index: {}]  }
   0x1   :  { %v25_v0 = vld [vmem:[%s393_s0 + $0x20] sm:$0x3]  ;;  %v22_v1 = vld [vmem:[%s393_s0 + $0x8] sm:$0xff]  ;;  %v24_v4 = vld [vmem:[%s393_s0 + $0x18] sm:$0xff]  ;;  %255 = vrcp.f32 %v267_v10 }
   0x2   :  { %v40_v2 = vsel %vm39_vm0, %v25_v0, 0.0  ;;  %v30_v3 = vsel %vm26_vm1, %v22_v1, 0.0  ;;  %v36_v5 = vsel %vm26_vm1, %v24_v4, 0.0  ;;  %v23_v6 = vld [vmem:[%s393_s0 + $0x10] sm:$0xff]  ;;  %v21_v7 = vld [vmem:[%s393_s0] sm:$0xff]  ;;  %v246_v42 = vld [vmem:[%s397_s1 + $0x8] sm:$0xff] }
   0x3   :  { %41 = vadd.xlane.f32.xlu0 %v40_v2  ;;  %31 = vadd.xlane.f32.xlu1 %v30_v3  ;;  %v33_v8 = vsel %vm26_vm1, %v23_v6, 0.0  ;;  %v27_v9 = vsel %vm26_vm1, %v21_v7, 0.0  ;;  %v245_v43 = vld [vmem:[%s397_s1] sm:$0xff] }
   0x4   :  { %37 = vadd.xlane.f32.xlu2 %v36_v5  ;;  %248 = vmatpush.bf16.msra.mxu2 %v246_v42 }
   0x5   :  { %201 = vmatpush.bf16.msra.mxu0 %v246_v42  ;;  %247 = vmatpush.bf16.msra.mxu1 %v246_v42 }
   0x7   :  { %v256_v11 = vpop.eup %255 }
   0x8   :  { %v44_v12 = vmul.f32 32.0, %v256_v11  ;;  %vm48_vm2 = vweird.f32 %v256_v11  ;;  %250 = vmatpush.bf16.msra.mxu2 %v245_v43 }
   0x9   :  { %202 = vmatpush.bf16.msra.mxu0 %v245_v43  ;;  %249 = vmatpush.bf16.msra.mxu1 %v245_v43 }
   0xa   :  { %v45_v13 = vsub.f32 1.0, %v44_v12 }
   0xb   :  { %34 = vadd.xlane.f32.xlu1 %v33_v8  ;;  %28 = vadd.xlane.f32.xlu0 %v27_v9 }
   0xc   :  { %v46_v14 = vmul.f32 %v256_v11, %v45_v13 }
   0xe   :  { %v47_v15 = vadd.f32 %v256_v11, %v46_v14 }
  0x10   :  { %v318_v16 = vsel %vm48_vm2, %v256_v11, %v47_v15  ;;  %v252_v11 = vld [vmem:[%s394_s3] ss:$0 sm:$0xff] }
  0x76   :  { %v42_v17 = vpop.xlane.xlu0 %41  ;;  %v32_v18 = vpop.xlane.xlu1 %31 }
  0x77   :  { %v54_v19 = vmul.f32 %v318_v16, %v42_v17  ;;  %v51_v20 = vmul.f32 %v318_v16, %v32_v18  ;;  %v38_v25 = vpop.xlane.xlu2 %37 }
  0x78   :  { %v53_v32 = vmul.f32 %v318_v16, %v38_v25 }
  0x79   :  { %v322_v21 = vsub.f32 %v25_v0, %v54_v19  ;;  %v324_v22 = vsub.f32 %v22_v1, %v51_v20 }
  0x7a   :  { %v339_v35 = vsub.f32 %v24_v4, %v53_v32 }
  0x7b   :  { %v64_v23 = vmul.f32 %v322_v21, %v322_v21  ;;  %v61_v24 = vmul.f32 %v324_v22, %v324_v22 }
  0x7c   :  { %v63_v40 = vmul.f32 %v339_v35, %v339_v35 }
  0x7d   :  { %v77_v26 = vsel %vm39_vm0, %v64_v23, 0.0  ;;  %v68_v27 = vsel %vm26_vm1, %v61_v24, 0.0 }
  0x7e   :  { %78 = vadd.xlane.f32.xlu2 %v77_v26  ;;  %69 = vadd.xlane.f32.xlu1 %v68_v27  ;;  %v35_v28 = vpop.xlane.xlu1 %34  ;;  %v29_v29 = vpop.xlane.xlu0 %28  ;;  %v74_v41 = vsel %vm26_vm1, %v63_v40, 0.0 }
  0x7f   :  { %v52_v30 = vmul.f32 %v318_v16, %v35_v28  ;;  %v50_v31 = vmul.f32 %v318_v16, %v29_v29 }
  0x81   :  { %v335_v33 = vsub.f32 %v23_v6, %v52_v30  ;;  %v337_v34 = vsub.f32 %v21_v7, %v50_v31 }
  0x83   :  { %v62_v36 = vmul.f32 %v335_v33, %v335_v33  ;;  %v60_v37 = vmul.f32 %v337_v34, %v337_v34 }
  0x85   :  { %v71_v38 = vsel %vm26_vm1, %v62_v36, 0.0  ;;  %v65_v39 = vsel %vm26_vm1, %v60_v37, 0.0 }
  0x86   :  { %72 = vadd.xlane.f32.xlu2 %v71_v38  ;;  %66 = vadd.xlane.f32.xlu0 %v65_v39 }
  0x8e   :  { %75 = vadd.xlane.f32.xlu0 %v74_v41 }
  0xf1   :  { %v79_v44 = vpop.xlane.xlu2 %78  ;;  %v70_v45 = vpop.xlane.xlu1 %69 }
  0xf2   :  { %v84_v46 = vmul.f32 %v79_v44, %v318_v16  ;;  %v81_v47 = vmul.f32 %v70_v45, %v318_v16 }
  0xf4   :  { %v89_v48 = vadd.f32 1e-05, %v84_v46  ;;  %v86_v49 = vadd.f32 1e-05, %v81_v47 }
  0xf6   :  { %257 = vrsqrt.f32 %v89_v48  ;;  %vm136_vm4 = vweird.f32 %v89_v48  ;;  %vm106_vm5 = vweird.f32 %v86_v49 }
  0xf7   :  { %259 = vrsqrt.f32 %v86_v49 }
  0xf9   :  { %v73_v50 = vpop.xlane.xlu2 %72  ;;  %v67_v51 = vpop.xlane.xlu0 %66 }
  0xfa   :  { %v82_v52 = vmul.f32 %v73_v50, %v318_v16  ;;  %v80_v53 = vmul.f32 %v67_v51, %v318_v16 }
  0xfc   :  { %v258_v54 = vpop.eup %257  ;;  %v87_v55 = vadd.f32 1e-05, %v82_v52  ;;  %v85_v56 = vadd.f32 1e-05, %v80_v53 }
  0xfd   :  { %v260_v57 = vpop.eup %259  ;;  %v131_v58 = vmul.f32 %v258_v54, %v89_v48  ;;  %vm137_vm3 = vweird.f32 %v258_v54 }
  0xfe   :  { %v101_v59 = vmul.f32 %v260_v57, %v86_v49  ;;  %261 = vrsqrt.f32 %v87_v55  ;;  %vm138_vm6 = vmor %vm136_vm4, %vm137_vm3  ;;  %vm107_vm7 = vweird.f32 %v260_v57  ;;  %vm116_vm9 = vweird.f32 %v87_v55 }
  0xff   :  { %v132_v60 = vmul.f32 %v258_v54, %v131_v58  ;;  %263 = vrsqrt.f32 %v85_v56  ;;  %vm108_vm8 = vmor %vm106_vm5, %vm107_vm7  ;;  %vm96_vm12 = vweird.f32 %v85_v56  ;;  %vm228_vm3 = vcmask 778240  }
 0x100   :  { %v102_v61 = vmul.f32 %v260_v57, %v101_v59  ;;  %vm223_vm4 = vcmask 781312  }
 0x101   :  { %v133_v62 = vmul.f32 0.5, %v132_v60  ;;  %v76_v63 = vpop.xlane.xlu0 %75 }
 0x102   :  { %v103_v0 = vmul.f32 0.5, %v102_v61  ;;  %v83_v1 = vmul.f32 %v76_v63, %v318_v16  ;;  %v253_v16 = vld [vmem:[%s395_s4] ss:$0 sm:$0xff] }
 0x103   :  { %v134_v2 = vsub.f32 1.5, %v133_v62 }
 0x104   :  { %v262_v3 = vpop.eup %261  ;;  %v104_v4 = vsub.f32 1.5, %v103_v0  ;;  %v88_v5 = vadd.f32 1e-05, %v83_v1 }
 0x105   :  { %v264_v6 = vpop.eup %263  ;;  %v135_v7 = vmul.f32 %v258_v54, %v134_v2  ;;  %v111_v8 = vmul.f32 %v262_v3, %v87_v55  ;;  %vm117_vm11 = vweird.f32 %v262_v3 }
 0x106   :  { %v105_v9 = vmul.f32 %v260_v57, %v104_v4  ;;  %v91_v10 = vmul.f32 %v264_v6, %v85_v56  ;;  %265 = vrsqrt.f32 %v88_v5  ;;  %vm97_vm10 = vweird.f32 %v264_v6  ;;  %vm118_vm14 = vmor %vm116_vm9, %vm117_vm11 }
 0x107   :  { %v139_v12 = vsel %vm138_vm6, %v258_v54, %v135_v7  ;;  %v112_v13 = vmul.f32 %v262_v3, %v111_v8  ;;  %vm98_vm13 = vmor %vm96_vm12, %vm97_vm10  ;;  %vm126_vm0 = vweird.f32 %v88_v5 }
 0x108   :  { %v92_v14 = vmul.f32 %v264_v6, %v91_v10  ;;  %v144_v15 = vmul.f32 %v139_v12, %v322_v21  ;;  %v109_v18 = vsel %vm108_vm8, %v260_v57, %v105_v9 }
 0x109   :  { %v113_v17 = vmul.f32 0.5, %v112_v13  ;;  %v141_v27 = vmul.f32 %v109_v18, %v324_v22 }
 0x10a   :  { %v93_v19 = vmul.f32 0.5, %v92_v14  ;;  %v153_v20 = vmul.f32 %v252_v11, %v144_v15 }
 0x10b   :  { %v114_v23 = vsub.f32 1.5, %v113_v17  ;;  %v150_v39 = vmul.f32 %v252_v11, %v141_v27 }
 0x10c   :  { %v266_v24 = vpop.eup %265  ;;  %v94_v25 = vsub.f32 1.5, %v93_v19  ;;  %v162_v26 = vadd.f32 %v253_v16, %v153_v20 }
 0x10d   :  { %v115_v28 = vmul.f32 %v262_v3, %v114_v23  ;;  %v121_v21 = vmul.f32 %v266_v24, %v88_v5  ;;  %vm127_vm15 = vweird.f32 %v266_v24  ;;  %v159_v44 = vadd.f32 %v253_v16, %v150_v39 }
 0x10e   :  { %v95_v29 = vmul.f32 %v264_v6, %v94_v25  ;;  %v165_v30 = vpack.c.bf16 %v162_v26, %v162_v26  ;;  %vm128_vm2 = vmor %vm126_vm0, %vm127_vm15 }
 0x10f   :  { %v122_v31 = vmul.f32 %v266_v24, %v121_v21  ;;  %v119_v36 = vsel %vm118_vm14, %v262_v3, %v115_v28 }
 0x110   :  { %v99_v32 = vsel %vm98_vm13, %v264_v6, %v95_v29  ;;  %244 = vmatmul.msk.bf16.vlgmr.msra.gmra.mxu2 %vm26_vm1, %v165_v30  ;;  %v142_v41 = vmul.f32 %v119_v36, %v335_v33  ;;  %v254_v33 = vld [vmem:[%s396_s2] ss:$0 sm:$0xff] }
 0x111   :  { %v140_v37 = vmul.f32 %v99_v32, %v337_v34  ;;  %v123_v38 = vmul.f32 0.5, %v122_v31 }
 0x112   :  { %v151_v48 = vmul.f32 %v252_v11, %v142_v41 }
 0x113   :  { %v124_v40 = vsub.f32 1.5, %v123_v38  ;;  %v149_v22 = vmul.f32 %v252_v11, %v140_v37 }
 0x114   :  { %v160_v49 = vadd.f32 %v253_v16, %v151_v48 }
 0x115   :  { %v125_v42 = vmul.f32 %v266_v24, %v124_v40  ;;  %v158_v43 = vadd.f32 %v253_v16, %v149_v22 }
 0x117   :  { %v129_v45 = vsel %vm128_vm2, %v266_v24, %v125_v42  ;;  %v163_v46 = vpack.c.bf16 %v159_v44, %v158_v43 }
 0x118   :  { %v143_v47 = vmul.f32 %v129_v45, %v339_v35 }
 0x119   :  { %242 = vmatmul.msk.bf16.vlgmr.msra.gmra.mxu0 %vm26_vm1, %v163_v46 }
 0x11a   :  { %v152_v34 = vmul.f32 %v252_v11, %v143_v47 }
 0x11c   :  { %v161_v50 = vadd.f32 %v253_v16, %v152_v34 }
 0x11e   :  { %v164_v51 = vpack.c.bf16 %v161_v50, %v160_v49 }
 0x120   :  { %243 = vmatmul.msk.bf16.vlgmr.msra.gmra.mxu1 %vm26_vm1, %v164_v51 }
 0x193   :  { %v214_v52 = vpop.f32.mrf.mxu2 }
 0x194   :  { %v215_v53 = vadd.f32 %v254_v33, %v214_v52 }
 0x196   :  { %v222_v54 = vpack.c.bf16 %v215_v53, %v215_v53  ;;  %v204_v55 = vpop.f32.mrf.mxu0 }
 0x197   :  { %v205_v56 = vadd.f32 %v254_v33, %v204_v55 }
 0x198   :  { %229 = vst.msk [vmem:[%s398_s5 + $0x10] sm:$0x1] %vm228_vm3, %v222_v54 }
 0x199   :  { %v218_v35 = vpack.c.bf16 %v205_v56, %v205_v56 }
 0x19b   :  { %224 = vst.msk [vmem:[%s398_s5] sm:$0xf] %vm223_vm4, %v218_v35  ;;  %v216_v57 = vpop.f32.mrf.mxu2 }
 0x19d   :  { %v209_v58 = vpop.f32.mrf.mxu1 }
 0x19e   :  { %v206_v59 = vpop.f32.mrf.mxu0  ;;  %v210_v60 = vadd.f32 %v254_v33, %v209_v58 }
 0x19f   :  { %v207_v61 = vadd.f32 %v254_v33, %v206_v59 }
 0x1a0   :  { %v220_v62 = vpack.c.bf16 %v210_v60, %v210_v60 }
 0x1a1   :  { %v219_v63 = vpack.c.bf16 %v207_v61, %v207_v61 }
 0x1a2   :  { %226 = vst.msk [vmem:[%s398_s5 + $0x8] sm:$0xf] %vm223_vm4, %v220_v62 }
 0x1a3   :  { %225 = vst.msk [vmem:[%s398_s5 + $0x4] sm:$0xf] %vm223_vm4, %v219_v63 }
 0x1a5   :  { %v211_v0 = vpop.f32.mrf.mxu1 }
 0x1a6   :  { %v212_v1 = vadd.f32 %v254_v33, %v211_v0 }
 0x1a8   :  { %v221_v2 = vpack.c.bf16 %v212_v1, %v212_v1 }
 0x1aa   :  { %227 = vst.msk [vmem:[%s398_s5 + $0xc] sm:$0xf] %vm223_vm4, %v221_v2 }

// kernel: _lambda_.20
= control target key start
LH: loop header
LB: loop body
LE: loop exit
PB: predicated region body
PF: predicated region fallthrough
CT: control target
= control target key end

     0   :  { %s827_s6 = smov 0   ;;  %s989_s0 = inlined_call_operand.vmem [shape: bf16[2,17,96], index: 0, kind: input, shape index: {}]   ;;  %s990_s1 = inlined_call_operand.vmem [shape: bf16[2,17,32], index: 1, kind: output, shape index: {}]  }
   0x1 LB: > { %s677_s7 = sadd.s32 4294967295, %s800_s6   ;;  %p681_p0 = scmp.ge.s32.totalorder %s800_s6, 1  ;;  %s800_s6 = sphi %s827_s6, %s11_s6  }
   0x2   : > { %p87_p1 = scmp.lt.s32.totalorder %s800_s6, 3 }
   0x4   : > { %p88_p2 = pnand %p681_p0, %p87_p1 }
   0x5   : > { %p107_p3 = scmp.lt.s32.totalorder (!%p88_p2), %s677_s7, 1  ;;  %s802_s12 = smov (!%p88_p2), 96  }
   0x6   : > { %91 = sbr.rel (%p88_p2) target bundleno = 1392 (0x570), region = 24  ;;  %s803_s13 = smov (!%p88_p2), 88  }
   0x7   : > { %s804_s14 = smov (!%p88_p2), 120   ;;  %s805_s15 = smov (!%p88_p2), 64  }
   0x8   : > { %s806_s16 = smov (!%p88_p2), 80   ;;  %s807_s17 = smov (!%p88_p2), 72  }
   0x9   : > { %s809_s18 = smov (!%p88_p2), 104   ;;  %s810_s19 = smov (!%p88_p2), 112  }
   0xa   : > { %s811_s20 = smov (!%p88_p2), 56   ;;  %s812_s21 = smov (!%p88_p2), 48  }
   0xb   : > { %s992_s7 = smov (!%p107_p3, %s677_s7), 1  ;;  %vm133_vm0 = vcmask 64512   ;;  %vm167_vm1 = vcmask 138240   ;;  %vm174_vm2 = vcmask 131072   ;;  %vm215_vm3 = vcmask 1040384   ;;  %s813_s22 = smov 40  }
   0xc   : > { %s707_s8 = smul.u32 12, %s992_s7  ;;  %v808_v39 = vmov 0   ;;  %s814_s23 = smov 8   ;;  %vm602_vm4 = vcmask 130048   ;;  %vm606_vm5 = vcmask 195584   ;;  %vm613_vm6 = vcmask 257024  }
   0xd   : > { %v873_v40 = vsel %vm215_vm3, 65535, %v808_v39  ;;  %s815_s24 = smov 24   ;;  %s816_s25 = smov 16   ;;  %vm616_vm7 = vcmask 253952   ;;  %vm617_vm8 = vsmask.f32 256 }
   0xe   : > { %s111_s11 = scalar_lea.vmem %s989_s0, %s707_s8  ;;  %s116_s28 = scalar_lea.vmem %s990_s1, %s707_s8  ;;  %vm618_vm9 = vmand %vm616_vm7, %vm617_vm8 }
   0xf   : > { %v120_v0 = vld [vmem:[%s111_s11 + $0x8] sm:$0x1]  ;;  %v846_v3 = vld [vmem:[%s111_s11] sm:$0xff] }
  0x10   : > { %v126_v1 = vunpack.c.l.b16 %v120_v0 }
  0x12   : > { %v843_v2 = vpack.c.b16 %v126_v1, %v126_v1 }
  0x14   : > { %131 = vrot.lane.b32.xlu0 %v843_v2, %s802_s12  ;;  %245 = vrot.lane.b32.xlu2 %v843_v2, %s803_s13 }
  0x1c   : > { %129 = vrot.lane.b32.xlu0 %v846_v3, %s802_s12  ;;  %239 = vrot.lane.b32.xlu2 %v846_v3, %s804_s14 }
  0x24   : > { %243 = vrot.lane.b32.xlu0 %v846_v3, %s803_s13 }
  0x6e   : > { %v246_v8 = vpop.permute.xlu2 %245 }
  0x6f   : > { %v257_v9 = vsel %vm133_vm0, %v246_v8, 0 }
  0x70   : > { %265 = vmatpush.bf16.xpose.msra.mxu2 %v257_v9 }
  0x76   : > { %v240_v14 = vpop.permute.xlu2 %239 }
  0x86   : > { %v132_v4 = vpop.permute.xlu0 %131 }
  0x87   : > { %v144_v5 = vsel %vm133_vm0, %v132_v4, 0 }
  0x88   : > { %152 = vmatpush.bf16.xpose.msra.mxu0 %v144_v5 }
  0x8e   : > { %v130_v6 = vpop.permute.xlu0 %129 }
  0x8f   : > { %v141_v7 = vsel %vm133_vm0, %v130_v6, 0 }
  0x90   : > { %153 = vmatpush.bf16.xpose.msra.mxu0 %v141_v7 }
  0x96   : > { %v244_v10 = vpop.permute.xlu0 %243 }
  0x97   : > { %688 = vmatmul.msk.bf16.vlgmr.msra.gmra.mxu0 %vm133_vm0, %v846_v3  ;;  %v254_v11 = vsel %vm133_vm0, %v244_v10, 0 }
  0x98   : > { %266 = vmatpush.bf16.xpose.msra.mxu2 %v254_v11 }
  0x9f   : > { %692 = vmatmul.msk.bf16.vlgmr.msra.gmra.mxu2 %vm133_vm0, %v240_v14 }
  0xa7   : > { %689 = vmatmul.msk.bf16.gmra.mxu0 %vm133_vm0, %v843_v2 }
 0x114   : > { %v155_v12 = vpop.f32.mrf.mxu0 }
 0x115   : > { %v164_v13 = vmul.f32 0.35355338, %v155_v12 }
 0x117   : > { %v168_v15 = vsel %vm167_vm1, %v164_v13, -inf }
 0x118   : > { %169 = vmax.xlane.f32.xlu1 %v168_v15 }
 0x11c   : > { %v157_v16 = vpop.f32.mrf.mxu0 }
 0x11d   : > { %v165_v17 = vmul.f32 0.35355338, %v157_v16 }
 0x11f   : > { %v171_v18 = vsel %vm167_vm1, %v165_v17, -inf }
 0x120   : > { %172 = vmax.xlane.f32.xlu1 %v171_v18 }
 0x122   : > { %v268_v42 = vpop.f32.mrf.mxu2 }
 0x123   : > { %v883_v43 = vmul.f32 0.35355338, %v268_v42 }
 0x124   : > { %v160_v19 = vpop.f32.mrf.mxu0 }
 0x125   : > { %v166_v20 = vmul.f32 0.35355338, %v160_v19  ;;  %v280_v44 = vsel %vm167_vm1, %v883_v43, -inf }
 0x127   : > { %v175_v21 = vsel %vm174_vm2, %v166_v20, -inf }
 0x128   : > { %176 = vmax.xlane.f32.xlu2 %v175_v21 }
 0x12a   : > { %v270_v46 = vpop.f32.mrf.mxu2 }
 0x12b   : > { %v278_v47 = vmul.f32 0.35355338, %v270_v46 }
 0x12c   : > { %v162_v22 = vpop.f32.mrf.mxu0 }
 0x12d   : > { %v283_v48 = vsel %vm167_vm1, %v278_v47, -inf }
 0x139   : > { %206 = vrot.lane.b32.xlu1 %v843_v2, %s805_s15 }
 0x140   : > { %204 = vrot.lane.b32.xlu2 %v846_v3, %s805_s15 }
 0x18b   : > { %v170_v23 = vpop.xlane.xlu1 %169 }
 0x18c   : > { %v178_v24 = vsub.f32 %v164_v13, %v170_v23 }
 0x18e   : > { %v181_v25 = vmul.f32 1.442695, %v178_v24 }
 0x190   : > { %746 = vpow2.f32 %v181_v25 }
 0x193   : > { %v173_v26 = vpop.xlane.xlu1 %172 }
 0x194   : > { %v179_v27 = vsub.f32 %v165_v17, %v173_v26 }
 0x196   : > { %v747_v28 = vpop.eup %746  ;;  %v183_v29 = vmul.f32 1.442695, %v179_v27 }
 0x197   : > { %v187_v30 = vsel %vm167_vm1, %v747_v28, 0.0 }
 0x198   : > { %748 = vpow2.f32 %v183_v29  ;;  %188 = vadd.xlane.f32.xlu1 %v187_v30 }
 0x19b   : > { %v177_v31 = vpop.xlane.xlu2 %176 }
 0x19c   : > { %v180_v32 = vsub.f32 %v166_v20, %v177_v31 }
 0x19e   : > { %v749_v33 = vpop.eup %748  ;;  %v185_v34 = vmul.f32 1.442695, %v180_v32 }
 0x19f   : > { %v190_v35 = vsel %vm167_vm1, %v749_v33, 0.0 }
 0x1a0   : > { %750 = vpow2.f32 %v185_v34  ;;  %191 = vadd.xlane.f32.xlu0 %v190_v35 }
 0x1a3   : > { %v205_v45 = vpop.permute.xlu2 %204 }
 0x1a6   : > { %v751_v36 = vpop.eup %750 }
 0x1a7   : > { %v193_v37 = vsel %vm174_vm2, %v751_v36, 0.0 }
 0x1a8   : > { %194 = vadd.xlane.f32.xlu2 %v193_v37 }
 0x1ab   : > { %v207_v38 = vpop.permute.xlu1 %206 }
 0x1ac   : > { %v219_v41 = vand.u32 %v873_v40, %v207_v38 }
 0x1ae   : > { %227 = vmatpush.bf16.msra.mxu1 %v219_v41 }
 0x1b1   : > { %353 = vrot.lane.b32.xlu1 %v843_v2, %s806_s16 }
 0x1b2   : > { %228 = vmatpush.bf16.msra.mxu1 %v205_v45 }
 0x1b4   : > { %351 = vrot.lane.b32.xlu0 %v846_v3, %s806_s16 }
 0x1b9   : > { %461 = vrot.lane.b32.xlu1 %v843_v2, %s807_s17 }
 0x1bc   : > { %455 = vrot.lane.b32.xlu0 %v846_v3, %s809_s18 }
 0x1c0   : > { %457 = vrot.lane.b32.xlu2 %v843_v2, %s809_s18 }
 0x1c1   : > { %241 = vrot.lane.b32.xlu1 %v843_v2, %s804_s14 }
 0x1c9   : > { %459 = vrot.lane.b32.xlu1 %v846_v3, %s807_s17 }
 0x1d1   : > { %347 = vrot.lane.b32.xlu1 %v846_v3, %s810_s19 }
 0x1d9   : > { %349 = vrot.lane.b32.xlu1 %v843_v2, %s810_s19 }
 0x1e6   : > { %281 = vmax.xlane.f32.xlu0 %v280_v44 }
 0x203   : > { %284 = vmax.xlane.f32.xlu1 %v283_v48 }
 0x20b   : > { %v189_v49 = vpop.xlane.xlu1 %188 }
 0x20c   : > { %752 = vrcp.f32 %v189_v49 }
 0x212   : > { %v753_v51 = vpop.eup %752 }
 0x213   : > { %v192_v50 = vpop.xlane.xlu0 %191  ;;  %v199_v53 = vmul.f32 %v753_v51, %v747_v28 }
 0x214   : > { %754 = vrcp.f32 %v192_v50 }
 0x21a   : > { %v755_v52 = vpop.eup %754 }
 0x21b   : > { %v200_v54 = vmul.f32 %v755_v52, %v749_v33  ;;  %v195_v55 = vpop.xlane.xlu2 %194 }
 0x21c   : > { %756 = vrcp.f32 %v195_v55 }
 0x21d   : > { %v202_v56 = vpack.c.bf16 %v200_v54, %v199_v53 }
 0x21f   : > { %690 = vmatmul.msk.bf16.vlgmr.msra.gmra.mxu1 %vm167_vm1, %v202_v56 }
 0x222   : > { %v757_v59 = vpop.eup %756 }
 0x223   : > { %v354_v57 = vpop.permute.xlu1 %353  ;;  %v201_v60 = vmul.f32 %v757_v59, %v751_v36  ;;  %v458_v9 = vpop.permute.xlu2 %457 }
 0x224   : > { %v365_v58 = vsel %vm133_vm0, %v354_v57, 0 }
 0x225   : > { %373 = vmatpush.bf16.xpose.msrb.mxu1 %v365_v58  ;;  %v203_v1 = vpack.c.bf16 %v201_v60, %v201_v60 }
 0x226   : > { %v352_v61 = vpop.permute.xlu0 %351 }
 0x227   : > { %v362_v62 = vsel %vm133_vm0, %v352_v61, 0 }
 0x22b   : > { %v462_v63 = vpop.permute.xlu1 %461 }
 0x22c   : > { %v473_v0 = vsel %vm133_vm0, %v462_v63, 0 }
 0x22d   : > { %481 = vmatpush.bf16.xpose.msrb.mxu0 %v473_v0  ;;  %374 = vmatpush.bf16.xpose.msrb.mxu1 %v362_v62 }
 0x22e   : > { %v456_v7 = vpop.permute.xlu0 %455 }
 0x22f   : > { %691 = vmatmul.msk.bf16.gmra.mxu1 %vm167_vm1, %v203_v1 }
 0x233   : > { %v242_v4 = vpop.permute.xlu1 %241 }
 0x234   : > { %693 = vmatmul.msk.bf16.gmra.mxu2 %vm133_vm0, %v242_v4 }
 0x23b   : > { %v460_v5 = vpop.permute.xlu1 %459 }
 0x23c   : > { %v470_v6 = vsel %vm133_vm0, %v460_v5, 0 }
 0x23d   : > { %482 = vmatpush.bf16.xpose.msrb.mxu0 %v470_v6 }
 0x243   : > { %v348_v8 = vpop.permute.xlu1 %347 }
 0x244   : > { %700 = vmatmul.msk.bf16.vlgmr.msrb.gmra.mxu0 %vm133_vm0, %v456_v7  ;;  %696 = vmatmul.msk.bf16.vlgmr.msrb.gmra.mxu1 %vm133_vm0, %v348_v8 }
 0x24b   : > { %v350_v10 = vpop.permute.xlu1 %349 }
 0x254   : > { %701 = vmatmul.msk.bf16.gmra.mxu0 %vm133_vm0, %v458_v9  ;;  %697 = vmatmul.msk.bf16.gmra.mxu1 %vm133_vm0, %v350_v10 }
 0x259   : > { %v282_v22 = vpop.xlane.xlu0 %281 }
 0x25a   : > { %v289_v25 = vsub.f32 %v883_v43, %v282_v22 }
 0x25c   : > { %v292_v27 = vmul.f32 1.442695, %v289_v25 }
 0x276   : > { %v285_v16 = vpop.xlane.xlu1 %284 }
 0x277   : > { %v290_v19 = vsub.f32 %v278_v47, %v285_v16 }
 0x279   : > { %v294_v20 = vmul.f32 1.442695, %v290_v19 }
 0x27b   : > { %758 = vpow2.f32 %v294_v20 }
 0x27c   : > { %760 = vpow2.f32 %v292_v27 }
 0x281   : > { %v908_v28 = vpop.eup %758 }
 0x282   : > { %v301_v32 = vsel %vm167_vm1, %v908_v28, 0.0  ;;  %v761_v36 = vpop.eup %760 }
 0x283   : > { %v298_v42 = vsel %vm167_vm1, %v761_v36, 0.0 }
 0x29c   : > { %v899_v11 = vpop.f32.mrf.mxu1 }
 0x2a4   : > { %v901_v12 = vpop.f32.mrf.mxu1 }
 0x2ac   : > { %v903_v13 = vpop.f32.mrf.mxu1 }
 0x2b4   : > { %v237_v14 = vpop.f32.mrf.mxu1 }
 0x2b7   : > { %v273_v15 = vpop.f32.mrf.mxu2 }
 0x2b8   : > { %v279_v17 = vmul.f32 0.35355338, %v273_v15 }
 0x2ba   : > { %v286_v18 = vsel %vm174_vm2, %v279_v17, -inf }
 0x2bb   : > { %287 = vmax.xlane.f32.xlu2 %v286_v18 }
 0x2bf   : > { %v275_v21 = vpop.f32.mrf.mxu2 }
 0x2c1   : > { %v484_v23 = vpop.f32.mrf.mxu0  ;;  %v376_v31 = vpop.f32.mrf.mxu1 }
 0x2c2   : > { %v493_v24 = vmul.f32 0.35355338, %v484_v23  ;;  %v913_v34 = vmul.f32 0.35355338, %v376_v31 }
 0x2c4   : > { %v496_v26 = vsel %vm167_vm1, %v493_v24, -inf  ;;  %v388_v38 = vsel %vm167_vm1, %v913_v34, -inf }
 0x2c5   : > { %497 = vmax.xlane.f32.xlu0 %v496_v26 }
 0x2c9   : > { %v486_v29 = vpop.f32.mrf.mxu0  ;;  %v378_v41 = vpop.f32.mrf.mxu1 }
 0x2ca   : > { %v494_v30 = vmul.f32 0.35355338, %v486_v29  ;;  %v919_v43 = vmul.f32 0.35355338, %v378_v41 }
 0x2cc   : > { %v499_v33 = vsel %vm167_vm1, %v494_v30, -inf  ;;  %v391_v45 = vsel %vm167_vm1, %v919_v43, -inf }
 0x2cd   : > { %302 = vadd.xlane.f32.xlu0 %v301_v32  ;;  %500 = vmax.xlane.f32.xlu1 %v499_v33 }
 0x2d1   : > { %v489_v35 = vpop.f32.mrf.mxu0  ;;  %v381_v61 = vpop.f32.mrf.mxu1 }
 0x2d2   : > { %v495_v37 = vmul.f32 0.35355338, %v489_v35  ;;  %v387_v22 = vmul.f32 0.35355338, %v381_v61 }
 0x2d4   : > { %v502_v39 = vsel %vm174_vm2, %v495_v37, -inf }
 0x2d5   : > { %389 = vmax.xlane.f32.xlu0 %v388_v38  ;;  %503 = vmax.xlane.f32.xlu2 %v502_v39 }
 0x2d6   : > { %299 = vadd.xlane.f32.xlu1 %v298_v42 }
 0x2d9   : > { %v491_v44 = vpop.f32.mrf.mxu0  ;;  %v383_v5 = vpop.f32.mrf.mxu1 }
 0x2de   : > { %392 = vmax.xlane.f32.xlu1 %v391_v45 }
 0x2ed   : > { %317 = vrot.lane.b32.xlu2 %v843_v2, %s811_s20 }
 0x2f7   : > { %315 = vrot.lane.b32.xlu1 %v846_v3, %s811_s20 }
 0x32e   : > { %v288_v46 = vpop.xlane.xlu2 %287 }
 0x32f   : > { %v291_v47 = vsub.f32 %v279_v17, %v288_v46 }
 0x331   : > { %v296_v48 = vmul.f32 1.442695, %v291_v47 }
 0x333   : > { %762 = vpow2.f32 %v296_v48 }
 0x338   : > { %v498_v49 = vpop.xlane.xlu0 %497 }
 0x339   : > { %v925_v50 = vpop.eup %762  ;;  %v505_v51 = vsub.f32 %v493_v24, %v498_v49  ;;  %v394_v24 = vsel %vm174_vm2, %v387_v22, -inf }
 0x33a   : > { %v304_v52 = vsel %vm174_vm2, %v925_v50, 0.0 }
 0x33b   : > { %v508_v53 = vmul.f32 1.442695, %v505_v51  ;;  %305 = vadd.xlane.f32.xlu0 %v304_v52 }
 0x33d   : > { %764 = vpow2.f32 %v508_v53 }
 0x340   : > { %v501_v54 = vpop.xlane.xlu1 %500  ;;  %v303_v9 = vpop.xlane.xlu0 %302 }
 0x341   : > { %v506_v55 = vsub.f32 %v494_v30, %v501_v54 }
 0x343   : > { %v929_v56 = vpop.eup %764  ;;  %v510_v57 = vmul.f32 1.442695, %v506_v55 }
 0x344   : > { %v514_v58 = vsel %vm167_vm1, %v929_v56, 0.0 }
 0x345   : > { %766 = vpow2.f32 %v510_v57  ;;  %515 = vadd.xlane.f32.xlu2 %v514_v58 }
 0x348   : > { %v504_v59 = vpop.xlane.xlu2 %503  ;;  %v390_v20 = vpop.xlane.xlu0 %389 }
 0x349   : > { %v507_v60 = vsub.f32 %v495_v37, %v504_v59  ;;  %v300_v8 = vpop.xlane.xlu1 %299  ;;  %v397_v21 = vsub.f32 %v913_v34, %v390_v20 }
 0x34b   : > { %v933_v62 = vpop.eup %766  ;;  %v512_v63 = vmul.f32 1.442695, %v507_v60 }
 0x34c   : > { %v517_v0 = vsel %vm167_vm1, %v933_v62, 0.0 }
 0x34d   : > { %768 = vpow2.f32 %v512_v63  ;;  %518 = vadd.xlane.f32.xlu1 %v517_v0 }
 0x34e   : > { %770 = vrcp.f32 %v300_v8 }
 0x34f   : > { %425 = vrot.lane.b32.xlu0 %v843_v2, %s812_s21  ;;  %772 = vrcp.f32 %v303_v9 }
 0x350   : > { %v318_v1 = vpop.permute.xlu2 %317 }
 0x351   : > { %v327_v4 = vand.u32 %v318_v1, %v873_v40  ;;  %v393_v10 = vpop.xlane.xlu1 %392 }
 0x352   : > { %v398_v23 = vsub.f32 %v919_v43, %v393_v10 }
 0x353   : > { %v940_v6 = vpop.eup %768  ;;  %335 = vmatpush.bf16.msra.mxu3 %v327_v4 }
 0x354   : > { %v520_v7 = vsel %vm174_vm2, %v940_v6, 0.0  ;;  %v771_v14 = vpop.eup %770  ;;  %v402_v25 = vmul.f32 1.442695, %v398_v23 }
 0x355   : > { %521 = vadd.xlane.f32.xlu1 %v520_v7  ;;  %v773_v15 = vpop.eup %772  ;;  %v310_v16 = vmul.f32 %v771_v14, %v761_v36 }
 0x356   : > { %v311_v18 = vmul.f32 %v773_v15, %v908_v28 }
 0x357   : > { %533 = vrot.lane.b32.xlu0 %v843_v2, %s813_s22  ;;  %v400_v2 = vmul.f32 1.442695, %v397_v21 }
 0x358   : > { %v313_v19 = vpack.c.bf16 %v311_v18, %v310_v16 }
 0x359   : > { %774 = vpow2.f32 %v400_v2 }
 0x35a   : > { %776 = vpow2.f32 %v402_v25 }
 0x35d   : > { %531 = vrot.lane.b32.xlu2 %v846_v3, %s813_s22 }
 0x35f   : > { %v775_v26 = vpop.eup %774 }
 0x360   : > { %v406_v27 = vsel %vm167_vm1, %v775_v26, 0.0  ;;  %v777_v28 = vpop.eup %776 }
 0x361   : > { %v409_v29 = vsel %vm167_vm1, %v777_v28, 0.0 }
 0x369   : > { %v316_v17 = vpop.permute.xlu1 %315 }
 0x36a   : > { %336 = vmatpush.bf16.msra.mxu3 %v316_v17 }
 0x36d   : > { %694 = vmatmul.msk.bf16.vlgmr.msra.gmra.mxu3 %vm167_vm1, %v313_v19 }
 0x381   : > { %395 = vmax.xlane.f32.xlu0 %v394_v24 }
 0x389   : > { %407 = vadd.xlane.f32.xlu0 %v406_v27 }
 0x391   : > { %410 = vadd.xlane.f32.xlu0 %v409_v29 }
 0x3a5   : > { %423 = vrot.lane.b32.xlu0 %v846_v3, %s812_s21 }
 0x3ae   : > { %v306_v30 = vpop.xlane.xlu0 %305 }
 0x3af   : > { %778 = vrcp.f32 %v306_v30 }
 0x3b5   : > { %v779_v31 = vpop.eup %778 }
 0x3b6   : > { %v312_v32 = vmul.f32 %v779_v31, %v925_v50 }
 0x3b8   : > { %v314_v33 = vpack.c.bf16 %v312_v32, %v312_v32  ;;  %v516_v37 = vpop.xlane.xlu2 %515 }
 0x3ba   : > { %695 = vmatmul.msk.bf16.gmra.mxu3 %vm167_vm1, %v314_v33 }
 0x3c0   : > { %v519_v34 = vpop.xlane.xlu1 %518  ;;  %v532_v43 = vpop.permute.xlu2 %531 }
 0x3c1   : > { %v426_v35 = vpop.permute.xlu0 %425  ;;  %780 = vrcp.f32 %v519_v34 }
 0x3c2   : > { %v435_v36 = vand.u32 %v426_v35, %v873_v40  ;;  %782 = vrcp.f32 %v516_v37 }
 0x3c4   : > { %443 = vmatpush.bf16.msrb.mxu3 %v435_v36 }
 0x3c7   : > { %v781_v39 = vpop.eup %780 }
 0x3c8   : > { %v783_v41 = vpop.eup %782  ;;  %v527_v42 = vmul.f32 %v781_v39, %v933_v62  ;;  %v522_v45 = vpop.xlane.xlu1 %521 }
 0x3c9   : > { %v534_v38 = vpop.permute.xlu0 %533  ;;  %v526_v44 = vmul.f32 %v783_v41, %v929_v56  ;;  %784 = vrcp.f32 %v522_v45 }
 0x3ca   : > { %v543_v3 = vand.u32 %v534_v38, %v873_v40 }
 0x3cb   : > { %v529_v46 = vpack.c.bf16 %v527_v42, %v526_v44 }
 0x3cc   : > { %551 = vmatpush.bf16.msrb.mxu2 %v543_v3  ;;  %v619_v3 = vld [vmem:[%s116_s28 + $0x8] sm:$0x1] }
 0x3cf   : > { %v785_v47 = vpop.eup %784 }
 0x3d0   : > { %552 = vmatpush.bf16.msrb.mxu2 %v532_v43  ;;  %v528_v48 = vmul.f32 %v785_v47, %v940_v6 }
 0x3d2   : > { %v530_v49 = vpack.c.bf16 %v528_v48, %v528_v48 }
 0x3d3   : > { %702 = vmatmul.msk.bf16.vlgmr.msrb.gmra.mxu2 %vm167_vm1, %v529_v46 }
 0x3e3   : > { %703 = vmatmul.msk.bf16.gmra.mxu2 %vm167_vm1, %v530_v49 }
 0x3f0   : > { %v338_v40 = vpop.f32.mrf.mxu3 }
 0x3f4   : > { %v396_v50 = vpop.xlane.xlu0 %395 }
 0x3f5   : > { %v399_v51 = vsub.f32 %v387_v22, %v396_v50 }
 0x3f7   : > { %v404_v52 = vmul.f32 1.442695, %v399_v51 }
 0x3f8   : > { %v340_v53 = vpop.f32.mrf.mxu3 }
 0x3f9   : > { %786 = vpow2.f32 %v404_v52  ;;  %568 = vrot.lane.b32.xlu2 %v340_v53, %s814_s23 }
 0x3fc   : > { %v408_v55 = vpop.xlane.xlu0 %407 }
 0x3ff   : > { %v787_v54 = vpop.eup %786 }
 0x400   : > { %v412_v56 = vsel %vm174_vm2, %v787_v54, 0.0 }
 0x401   : > { %413 = vadd.xlane.f32.xlu0 %v412_v56 }
 0x404   : > { %v411_v57 = vpop.xlane.xlu0 %410 }
 0x405   : > { %788 = vrcp.f32 %v411_v57 }
 0x406   : > { %790 = vrcp.f32 %v408_v55 }
 0x40b   : > { %v789_v58 = vpop.eup %788 }
 0x40c   : > { %v791_v59 = vpop.eup %790  ;;  %v419_v60 = vmul.f32 %v789_v58, %v777_v28 }
 0x40d   : > { %v418_v61 = vmul.f32 %v791_v59, %v775_v26 }
 0x40f   : > { %v421_v63 = vpack.c.bf16 %v419_v60, %v418_v61 }
 0x417   : > { %v424_v62 = vpop.permute.xlu0 %423 }
 0x418   : > { %444 = vmatpush.bf16.msrb.mxu3 %v424_v62 }
 0x41b   : > { %698 = vmatmul.msk.bf16.vlgmr.msrb.gmra.mxu3 %vm167_vm1, %v421_v63 }
 0x43d   : > { %v343_v0 = vpop.f32.mrf.mxu3 }
 0x43e   : > { %v731_v1 = vpack.i.bf16 %v338_v40, %v343_v0 }
 0x440   : > { %732 = vrot.lane.b32.xlu1 %v731_v1, %s814_s23 }
 0x445   : > { %v345_v4 = vpop.f32.mrf.mxu3 }
 0x453   : > { %v569_v22 = vpop.permute.xlu2 %568 }
 0x454   : > { %v600_v23 = vsel %vm133_vm0, %v901_v12, %v569_v22 }
 0x456   : > { %v554_v5 = vpop.f32.mrf.mxu2 }
 0x45e   : > { %v556_v6 = vpop.f32.mrf.mxu2 }
 0x45f   : > { %592 = vrot.lane.b32.xlu0 %v556_v6, %s815_s24 }
 0x466   : > { %v559_v7 = vpop.f32.mrf.mxu2 }
 0x467   : > { %v741_v8 = vpack.i.bf16 %v554_v5, %v559_v7 }
 0x46e   : > { %v561_v9 = vpop.f32.mrf.mxu2 }
 0x474   : > { %v414_v10 = vpop.xlane.xlu0 %413 }
 0x475   : > { %792 = vrcp.f32 %v414_v10 }
 0x47b   : > { %v793_v14 = vpop.eup %792 }
 0x47c   : > { %v420_v15 = vmul.f32 %v793_v14, %v787_v54 }
 0x47e   : > { %v422_v16 = vpack.c.bf16 %v420_v15, %v420_v15 }
 0x480   : > { %699 = vmatmul.msk.bf16.gmra.mxu3 %vm167_vm1, %v422_v16 }
 0x49e   : > { %v446_v17 = vpop.f32.mrf.mxu3 }
 0x4a6   : > { %v448_v18 = vpop.f32.mrf.mxu3 }
 0x4a7   : > { %580 = vrot.lane.b32.xlu1 %v448_v18, %s816_s25 }
 0x4b2   : > { %v733_v2 = vpop.permute.xlu1 %732 }
 0x4b3   : > { %v735_v30 = vunpack.i.h.bf16 %v733_v2  ;;  %v734_v31 = vunpack.i.l.bf16 %v733_v2 }
 0x4b5   : > { %v599_v34 = vsel %vm133_vm0, %v899_v11, %v735_v30  ;;  %v601_v35 = vsel %vm133_vm0, %v903_v13, %v734_v31 }
 0x4d1   : > { %v593_v25 = vpop.permute.xlu0 %592 }
 0x503   : > { %v451_v19 = vpop.f32.mrf.mxu3 }
 0x504   : > { %v736_v20 = vpack.i.bf16 %v446_v17, %v451_v19 }
 0x506   : > { %737 = vrot.lane.b32.xlu2 %v736_v20, %s816_s25 }
 0x50b   : > { %v453_v21 = vpop.f32.mrf.mxu3 }
 0x50e   : > { %742 = vrot.lane.b32.xlu2 %v741_v8, %s815_s24 }
 0x519   : > { %v581_v24 = vpop.permute.xlu1 %580 }
 0x51a   : > { %v604_v26 = vsel %vm602_vm4, %v600_v23, %v581_v24 }
 0x51b   : > { %v608_v27 = vsel %vm606_vm5, %v604_v26, %v593_v25 }
 0x51c   : > { %v611_v28 = vpack.c.bf16 %v608_v27, %v608_v27 }
 0x51e   : > { %615 = vst.msk [vmem:[%s116_s28 + $0x4] sm:$0xf] %vm613_vm6, %v611_v28 }
 0x560   : > { %v738_v29 = vpop.permute.xlu2 %737 }
 0x561   : > { %v740_v32 = vunpack.i.h.bf16 %v738_v29  ;;  %v739_v12 = vunpack.i.l.bf16 %v738_v29 }
 0x563   : > { %v603_v38 = vsel %vm602_vm4, %v599_v34, %v740_v32  ;;  %v605_v39 = vsel %vm602_vm4, %v601_v35, %v739_v12 }
 0x568   : > { %v743_v33 = vpop.permute.xlu2 %742 }
 0x569   : > { %v745_v36 = vunpack.i.h.bf16 %v743_v33  ;;  %v744_v37 = vunpack.i.l.bf16 %v743_v33 }
 0x56b   : > { %v607_v41 = vsel %vm606_vm5, %v603_v38, %v745_v36  ;;  %v609_v42 = vsel %vm606_vm5, %v605_v39, %v744_v37 }
 0x56c   : > { %v610_v43 = vpack.c.bf16 %v607_v41, %v607_v41  ;;  %v612_v44 = vpack.c.bf16 %v609_v42, %v609_v42 }
 0x56e   : > { %614 = vst.msk [vmem:[%s116_s28] sm:$0xf] %vm613_vm6, %v610_v43  ;;  %v620_v11 = vsel %vm618_vm9, %v612_v44, %v619_v3 }
 0x56f   : > { %621 = vst [vmem:[%s116_s28 + $0x8] sm:$0x1] %v620_v11 }
 0x570 PF: > { %s11_s6 = sadd.s32 1, %s800_s6  }
 0x571   : > { %p8_p4 = scmp.ge.s32.totalorder %s11_s6, 4  }
 0x573   :  { %10 = sbr.rel (!%p8_p4) target bundleno = 1 (0x1), region = 54 }

// kernel: _lambda_.18
= control target key start
LH: loop header
LB: loop body
LE: loop exit
PB: predicated region body
PF: predicated region fallthrough
CT: control target
= control target key end

     0   :  { %vm19_vm0 = vcmask 261120   ;;  %vm32_vm1 = vcmask 254976   ;;  %v180_v10 = vmov 32.0   ;;  %s277_s0 = inlined_call_operand.vmem [shape: f32[34,32], index: 0, kind: input, shape index: {}]   ;;  %s278_s1 = inlined_call_operand.vmem [shape: f32[1,32], index: 1, kind: input, shape index: {}]   ;;  %s279_s2 = inlined_call_operand.vmem [shape: f32[1,32], index: 2, kind: input, shape index: {}]   ;;  %s280_s3 = inlined_call_operand.vmem [shape: f32[34,32], index: 3, kind: output, shape index: {}]  }
   0x1   :  { %v16_v0 = vld [vmem:[%s277_s0 + $0x10] sm:$0xff]  ;;  %v14_v1 = vld [vmem:[%s277_s0] sm:$0xff]  ;;  %v17_v6 = vld [vmem:[%s277_s0 + $0x18] sm:$0xff]  ;;  %168 = vrcp.f32 %v180_v10 }
   0x2   :  { %v26_v2 = vsel %vm19_vm0, %v16_v0, 0.0  ;;  %v20_v3 = vsel %vm19_vm0, %v14_v1, 0.0  ;;  %v18_v4 = vld [vmem:[%s277_s0 + $0x20] sm:$0x3]  ;;  %v15_v7 = vld [vmem:[%s277_s0 + $0x8] sm:$0xff]  ;;  %v29_v8 = vsel %vm19_vm0, %v17_v6, 0.0 }
   0x3   :  { %27 = vadd.xlane.f32.xlu1 %v26_v2  ;;  %21 = vadd.xlane.f32.xlu0 %v20_v3  ;;  %v33_v5 = vsel %vm32_vm1, %v18_v4, 0.0  ;;  %v23_v9 = vsel %vm19_vm0, %v15_v7, 0.0 }
   0x4   :  { %34 = vadd.xlane.f32.xlu2 %v33_v5 }
   0x7   :  { %v169_v11 = vpop.eup %168 }
   0x8   :  { %v37_v12 = vmul.f32 32.0, %v169_v11  ;;  %vm41_vm2 = vweird.f32 %v169_v11 }
   0xa   :  { %v38_v13 = vsub.f32 1.0, %v37_v12  ;;  %v167_v12 = vld [vmem:[%s279_s2] ss:$0 sm:$0xff] }
   0xb   :  { %30 = vadd.xlane.f32.xlu1 %v29_v8  ;;  %24 = vadd.xlane.f32.xlu0 %v23_v9 }
   0xc   :  { %v39_v14 = vmul.f32 %v169_v11, %v38_v13 }
   0xe   :  { %v40_v15 = vadd.f32 %v169_v11, %v39_v14 }
  0x10   :  { %v42_v16 = vsel %vm41_vm2, %v169_v11, %v40_v15 }
  0x76   :  { %v28_v17 = vpop.xlane.xlu1 %27  ;;  %v22_v18 = vpop.xlane.xlu0 %21 }
  0x77   :  { %v45_v19 = vmul.f32 %v42_v16, %v28_v17  ;;  %v43_v20 = vmul.f32 %v42_v16, %v22_v18  ;;  %v35_v25 = vpop.xlane.xlu2 %34 }
  0x78   :  { %v47_v32 = vmul.f32 %v42_v16, %v35_v25 }
  0x79   :  { %v221_v21 = vsub.f32 %v16_v0, %v45_v19  ;;  %v223_v22 = vsub.f32 %v14_v1, %v43_v20 }
  0x7a   :  { %v235_v35 = vsub.f32 %v18_v4, %v47_v32 }
  0x7b   :  { %v55_v23 = vmul.f32 %v221_v21, %v221_v21  ;;  %v53_v24 = vmul.f32 %v223_v22, %v223_v22 }
  0x7c   :  { %v57_v40 = vmul.f32 %v235_v35, %v235_v35 }
  0x7d   :  { %v64_v26 = vsel %vm19_vm0, %v55_v23, 0.0  ;;  %v58_v27 = vsel %vm19_vm0, %v53_v24, 0.0 }
  0x7e   :  { %65 = vadd.xlane.f32.xlu1 %v64_v26  ;;  %v31_v28 = vpop.xlane.xlu1 %30  ;;  %59 = vadd.xlane.f32.xlu2 %v58_v27  ;;  %v25_v29 = vpop.xlane.xlu0 %24  ;;  %v70_v41 = vsel %vm32_vm1, %v57_v40, 0.0 }
  0x7f   :  { %v46_v30 = vmul.f32 %v42_v16, %v31_v28  ;;  %v44_v31 = vmul.f32 %v42_v16, %v25_v29 }
  0x81   :  { %v231_v33 = vsub.f32 %v17_v6, %v46_v30  ;;  %v233_v34 = vsub.f32 %v15_v7, %v44_v31  ;;  %v166_v7 = vld [vmem:[%s278_s1] ss:$0 sm:$0xff] }
  0x83   :  { %v56_v36 = vmul.f32 %v231_v33, %v231_v33  ;;  %v54_v37 = vmul.f32 %v233_v34, %v233_v34 }
  0x85   :  { %v67_v38 = vsel %vm19_vm0, %v56_v36, 0.0  ;;  %v61_v39 = vsel %vm19_vm0, %v54_v37, 0.0 }
  0x86   :  { %68 = vadd.xlane.f32.xlu2 %v67_v38  ;;  %62 = vadd.xlane.f32.xlu0 %v61_v39 }
  0x8e   :  { %71 = vadd.xlane.f32.xlu0 %v70_v41 }
  0xf1   :  { %v66_v42 = vpop.xlane.xlu1 %65  ;;  %v60_v43 = vpop.xlane.xlu2 %59 }
  0xf2   :  { %v75_v44 = vmul.f32 %v66_v42, %v42_v16  ;;  %v73_v45 = vmul.f32 %v60_v43, %v42_v16 }
  0xf4   :  { %v80_v46 = vadd.f32 1e-05, %v75_v44  ;;  %v78_v47 = vadd.f32 1e-05, %v73_v45 }
  0xf6   :  { %170 = vrsqrt.f32 %v80_v46  ;;  %vm109_vm3 = vweird.f32 %v80_v46  ;;  %vm89_vm7 = vweird.f32 %v78_v47 }
  0xf7   :  { %172 = vrsqrt.f32 %v78_v47 }
  0xf9   :  { %v69_v48 = vpop.xlane.xlu2 %68  ;;  %v63_v49 = vpop.xlane.xlu0 %62 }
  0xfa   :  { %v76_v50 = vmul.f32 %v69_v48, %v42_v16  ;;  %v74_v51 = vmul.f32 %v63_v49, %v42_v16 }
  0xfc   :  { %v171_v52 = vpop.eup %170  ;;  %v81_v53 = vadd.f32 1e-05, %v76_v50  ;;  %v79_v54 = vadd.f32 1e-05, %v74_v51 }
  0xfd   :  { %v173_v55 = vpop.eup %172  ;;  %v104_v56 = vmul.f32 %v171_v52, %v80_v46  ;;  %vm110_vm4 = vweird.f32 %v171_v52 }
  0xfe   :  { %v84_v57 = vmul.f32 %v173_v55, %v78_v47  ;;  %174 = vrsqrt.f32 %v81_v53  ;;  %vm90_vm5 = vweird.f32 %v173_v55  ;;  %vm111_vm6 = vmor %vm109_vm3, %vm110_vm4  ;;  %vm119_vm9 = vweird.f32 %v81_v53 }
  0xff   :  { %v105_v58 = vmul.f32 %v171_v52, %v104_v56  ;;  %176 = vrsqrt.f32 %v79_v54  ;;  %vm91_vm8 = vmor %vm89_vm7, %vm90_vm5  ;;  %vm99_vm13 = vweird.f32 %v79_v54 }
 0x100   :  { %v85_v59 = vmul.f32 %v173_v55, %v84_v57 }
 0x101   :  { %v106_v60 = vmul.f32 0.5, %v105_v58  ;;  %v72_v61 = vpop.xlane.xlu0 %71 }
 0x102   :  { %v86_v62 = vmul.f32 0.5, %v85_v59  ;;  %v77_v63 = vmul.f32 %v72_v61, %v42_v16 }
 0x103   :  { %v107_v0 = vsub.f32 1.5, %v106_v60 }
 0x104   :  { %v175_v1 = vpop.eup %174  ;;  %v87_v2 = vsub.f32 1.5, %v86_v62  ;;  %v82_v3 = vadd.f32 1e-05, %v77_v63 }
 0x105   :  { %v177_v4 = vpop.eup %176  ;;  %v108_v5 = vmul.f32 %v171_v52, %v107_v0  ;;  %v114_v6 = vmul.f32 %v175_v1, %v81_v53  ;;  %vm120_vm10 = vweird.f32 %v175_v1 }
 0x106   :  { %v88_v8 = vmul.f32 %v173_v55, %v87_v2  ;;  %v94_v9 = vmul.f32 %v177_v4, %v79_v54  ;;  %178 = vrsqrt.f32 %v82_v3  ;;  %vm100_vm11 = vweird.f32 %v177_v4  ;;  %vm121_vm12 = vmor %vm119_vm9, %vm120_vm10 }
 0x107   :  { %v112_v10 = vsel %vm111_vm6, %v171_v52, %v108_v5  ;;  %v115_v11 = vmul.f32 %v175_v1, %v114_v6  ;;  %vm101_vm14 = vmor %vm99_vm13, %vm100_vm11  ;;  %vm129_vm2 = vweird.f32 %v82_v3 }
 0x108   :  { %v135_v13 = vmul.f32 %v112_v10, %v221_v21  ;;  %v92_v14 = vsel %vm91_vm8, %v173_v55, %v88_v8  ;;  %v95_v15 = vmul.f32 %v177_v4, %v94_v9 }
 0x109   :  { %v133_v16 = vmul.f32 %v92_v14, %v223_v22  ;;  %v116_v17 = vmul.f32 0.5, %v115_v11 }
 0x10a   :  { %v144_v18 = vmul.f32 %v166_v7, %v135_v13  ;;  %v96_v19 = vmul.f32 0.5, %v95_v15 }
 0x10b   :  { %v142_v20 = vmul.f32 %v166_v7, %v133_v16  ;;  %v117_v23 = vsub.f32 1.5, %v116_v17 }
 0x10c   :  { %v179_v24 = vpop.eup %178  ;;  %v153_v25 = vadd.f32 %v167_v12, %v144_v18  ;;  %v97_v26 = vsub.f32 1.5, %v96_v19 }
 0x10d   :  { %v151_v27 = vadd.f32 %v167_v12, %v142_v20  ;;  %v118_v28 = vmul.f32 %v175_v1, %v117_v23  ;;  %v124_v29 = vmul.f32 %v179_v24, %v82_v3  ;;  %vm130_vm15 = vweird.f32 %v179_v24 }
 0x10e   :  { %158 = vst.msk [vmem:[%s280_s3 + $0x10] sm:$0xff] %vm19_vm0, %v153_v25  ;;  %v98_v21 = vmul.f32 %v177_v4, %v97_v26  ;;  %vm131_vm3 = vmor %vm129_vm2, %vm130_vm15 }
 0x10f   :  { %156 = vst.msk [vmem:[%s280_s3] sm:$0xff] %vm19_vm0, %v151_v27  ;;  %v122_v22 = vsel %vm121_vm12, %v175_v1, %v118_v28  ;;  %v125_v30 = vmul.f32 %v179_v24, %v124_v29 }
 0x110   :  { %v136_v31 = vmul.f32 %v122_v22, %v231_v33  ;;  %v102_v32 = vsel %vm101_vm14, %v177_v4, %v98_v21 }
 0x111   :  { %v134_v36 = vmul.f32 %v102_v32, %v233_v34  ;;  %v126_v37 = vmul.f32 0.5, %v125_v30 }
 0x112   :  { %v145_v38 = vmul.f32 %v166_v7, %v136_v31 }
 0x113   :  { %v143_v39 = vmul.f32 %v166_v7, %v134_v36  ;;  %v127_v40 = vsub.f32 1.5, %v126_v37 }
 0x114   :  { %v154_v41 = vadd.f32 %v167_v12, %v145_v38 }
 0x115   :  { %v152_v42 = vadd.f32 %v167_v12, %v143_v39  ;;  %v128_v43 = vmul.f32 %v179_v24, %v127_v40 }
 0x116   :  { %159 = vst.msk [vmem:[%s280_s3 + $0x18] sm:$0xff] %vm19_vm0, %v154_v41 }
 0x117   :  { %157 = vst.msk [vmem:[%s280_s3 + $0x8] sm:$0xff] %vm19_vm0, %v152_v42  ;;  %v132_v33 = vsel %vm131_vm3, %v179_v24, %v128_v43 }
 0x118   :  { %v137_v34 = vmul.f32 %v132_v33, %v235_v35 }
 0x11a   :  { %v146_v44 = vmul.f32 %v166_v7, %v137_v34 }
 0x11c   :  { %v155_v45 = vadd.f32 %v167_v12, %v146_v44 }
 0x11e   :  { %160 = vst.msk [vmem:[%s280_s3 + $0x20] sm:$0x3] %vm32_vm1, %v155_v45 }

// kernel: _lambda_.21
= control target key start
LH: loop header
LB: loop body
LE: loop exit
PB: predicated region body
PF: predicated region fallthrough
CT: control target
= control target key end

     0   :  { %vm56_vm0 = vcmask 261120   ;;  %vm103_vm1 = vcmask 254976   ;;  %s217_s1 = inlined_call_operand.vmem [shape: bf16[32,32], index: 1, kind: input, shape index: {}]   ;;  %s218_s0 = inlined_call_operand.vmem [shape: bf16[34,32], index: 0, kind: input, shape index: {}]   ;;  %s219_s2 = inlined_call_operand.vmem [shape: f32[1,32], index: 2, kind: input, shape index: {}]   ;;  %s220_s3 = inlined_call_operand.vmem [shape: f32[34,32], index: 3, kind: input, shape index: {}]   ;;  %s221_s4 = inlined_call_operand.vmem [shape: f32[34,32], index: 4, kind: output, shape index: {}]  }
   0x1   :  { %v131_v0 = vld [vmem:[%s217_s1 + $0x8] sm:$0xff]  ;;  %v22_v1 = vld [vmem:[%s218_s0 + $0x10] sm:$0x1]  ;;  %v130_v2 = vld [vmem:[%s217_s1] sm:$0xff] }
   0x2   :  { %72 = vmatpush.bf16.msra.mxu0 %v131_v0  ;;  %132 = vmatpush.bf16.msra.mxu1 %v131_v0  ;;  %v40_v3 = vunpack.c.l.b16 %v22_v1  ;;  %v128_v4 = vld [vmem:[%s218_s0] sm:$0xff]  ;;  %v129_v5 = vld [vmem:[%s218_s0 + $0x8] sm:$0xff]  ;;  %v91_v11 = vld [vmem:[%s220_s3 + $0x10] sm:$0xff] }
   0x3   :  { %133 = vmatpush.bf16.msra.mxu2 %v131_v0  ;;  %v136_v7 = vld [vmem:[%s219_s2] ss:$0 sm:$0xff]  ;;  %v90_v20 = vld [vmem:[%s220_s3 + $0x8] sm:$0xff]  ;;  %v92_v22 = vld [vmem:[%s220_s3 + $0x18] sm:$0xff] }
   0x4   :  { %v43_v6 = vpack.c.b16 %v40_v3, %v40_v3  ;;  %v89_v9 = vld [vmem:[%s220_s3] sm:$0xff] }
   0x5   :  { %v93_v17 = vld [vmem:[%s220_s3 + $0x20] sm:$0x3] }
   0x6   :  { %73 = vmatpush.bf16.msra.mxu0 %v130_v2  ;;  %134 = vmatpush.bf16.msra.mxu1 %v130_v2 }
   0x7   :  { %135 = vmatpush.bf16.msra.mxu2 %v130_v2 }
   0x9   :  { %125 = vmatmul.msk.bf16.vlgmr.msra.gmra.mxu0 %vm56_vm0, %v128_v4  ;;  %126 = vmatmul.msk.bf16.vlgmr.msra.gmra.mxu1 %vm56_vm0, %v129_v5 }
   0xa   :  { %127 = vmatmul.msk.bf16.vlgmr.msra.gmra.mxu2 %vm56_vm0, %v43_v6 }
  0x86   :  { %v75_v8 = vpop.f32.mrf.mxu0  ;;  %v80_v10 = vpop.f32.mrf.mxu1 }
  0x87   :  { %v76_v12 = vadd.f32 %v136_v7, %v75_v8  ;;  %v81_v13 = vadd.f32 %v136_v7, %v80_v10 }
  0x89   :  { %v94_v14 = vadd.f32 %v89_v9, %v76_v12  ;;  %v96_v15 = vadd.f32 %v91_v11, %v81_v13 }
  0x8b   :  { %99 = vst.msk [vmem:[%s221_s4] sm:$0xff] %vm56_vm0, %v94_v14 }
  0x8c   :  { %101 = vst.msk [vmem:[%s221_s4 + $0x10] sm:$0xff] %vm56_vm0, %v96_v15 }
  0x8d   :  { %v85_v16 = vpop.f32.mrf.mxu2 }
  0x8e   :  { %v86_v18 = vadd.f32 %v136_v7, %v85_v16  ;;  %v77_v19 = vpop.f32.mrf.mxu0  ;;  %v82_v21 = vpop.f32.mrf.mxu1 }
  0x8f   :  { %v78_v23 = vadd.f32 %v136_v7, %v77_v19  ;;  %v83_v24 = vadd.f32 %v136_v7, %v82_v21 }
  0x90   :  { %v98_v25 = vadd.f32 %v93_v17, %v86_v18 }
  0x91   :  { %v95_v26 = vadd.f32 %v90_v20, %v78_v23  ;;  %v97_v27 = vadd.f32 %v92_v22, %v83_v24 }
  0x92   :  { %104 = vst.msk [vmem:[%s221_s4 + $0x20] sm:$0x3] %vm103_vm1, %v98_v25 }
  0x93   :  { %100 = vst.msk [vmem:[%s221_s4 + $0x8] sm:$0xff] %vm56_vm0, %v95_v26 }
  0x94   :  { %102 = vst.msk [vmem:[%s221_s4 + $0x18] sm:$0xff] %vm56_vm0, %v97_v27 }
  0x95   :  { %v87_v28 = vpop.f32.mrf.mxu2 }

// kernel: _lambda_.22
= control target key start
LH: loop header
LB: loop body
LE: loop exit
PB: predicated region body
PF: predicated region fallthrough
CT: control target
= control target key end

     0   :  { %vm26_vm0 = vcmask 261120   ;;  %vm39_vm1 = vcmask 254976   ;;  %v406_v10 = vmov 32.0   ;;  %s591_s0 = inlined_call_operand.vmem [shape: f32[34,32], index: 0, kind: input, shape index: {}]   ;;  %s592_s3 = inlined_call_operand.vmem [shape: f32[1,32], index: 3, kind: input, shape index: {}]   ;;  %s593_s4 = inlined_call_operand.vmem [shape: f32[1,32], index: 4, kind: input, shape index: {}]   ;;  %s594_s2 = inlined_call_operand.vmem [shape: f32[1,128], index: 2, kind: input, shape index: {}]   ;;  %s595_s1 = inlined_call_operand.vmem [shape: bf16[32,128], index: 1, kind: input, shape index: {}]   ;;  %s596_s5 = inlined_call_operand.vmem [shape: bf16[34,128], index: 5, kind: output, shape index: {}]  }
   0x1   :  { %v23_v0 = vld [vmem:[%s591_s0 + $0x10] sm:$0xff]  ;;  %v21_v1 = vld [vmem:[%s591_s0] sm:$0xff]  ;;  %v24_v6 = vld [vmem:[%s591_s0 + $0x18] sm:$0xff]  ;;  %374 = vrcp.f32 %v406_v10 }
   0x2   :  { %v33_v2 = vsel %vm26_vm0, %v23_v0, 0.0  ;;  %v27_v3 = vsel %vm26_vm0, %v21_v1, 0.0  ;;  %v25_v4 = vld [vmem:[%s591_s0 + $0x20] sm:$0x3]  ;;  %v22_v7 = vld [vmem:[%s591_s0 + $0x8] sm:$0xff]  ;;  %v36_v8 = vsel %vm26_vm0, %v24_v6, 0.0 }
   0x3   :  { %34 = vadd.xlane.f32.xlu1 %v33_v2  ;;  %28 = vadd.xlane.f32.xlu0 %v27_v3  ;;  %v40_v5 = vsel %vm39_vm1, %v25_v4, 0.0  ;;  %v30_v9 = vsel %vm26_vm0, %v22_v7, 0.0  ;;  %v354_v42 = vld [vmem:[%s595_s1 + $0x8] sm:$0xff]  ;;  %v353_v49 = vld [vmem:[%s595_s1] sm:$0xff] }
   0x4   :  { %41 = vadd.xlane.f32.xlu2 %v40_v5  ;;  %201 = vmatpush.bf16.msra.mxu0 %v354_v42 }
   0x5   :  { %366 = vmatpush.bf16.msra.mxu1 %v354_v42  ;;  %367 = vmatpush.bf16.msra.mxu2 %v354_v42 }
   0x7   :  { %v375_v11 = vpop.eup %374 }
   0x8   :  { %v44_v12 = vmul.f32 32.0, %v375_v11  ;;  %vm48_vm2 = vweird.f32 %v375_v11  ;;  %202 = vmatpush.bf16.msra.mxu0 %v353_v49 }
   0x9   :  { %368 = vmatpush.bf16.msra.mxu1 %v353_v49  ;;  %369 = vmatpush.bf16.msra.mxu2 %v353_v49 }
   0xa   :  { %v45_v13 = vsub.f32 1.0, %v44_v12 }
   0xb   :  { %37 = vadd.xlane.f32.xlu1 %v36_v8  ;;  %31 = vadd.xlane.f32.xlu0 %v30_v9 }
   0xc   :  { %v46_v14 = vmul.f32 %v375_v11, %v45_v13 }
   0xe   :  { %v47_v15 = vadd.f32 %v375_v11, %v46_v14 }
  0x10   :  { %v457_v16 = vsel %vm48_vm2, %v375_v11, %v47_v15 }
  0x76   :  { %v35_v17 = vpop.xlane.xlu1 %34  ;;  %v29_v18 = vpop.xlane.xlu0 %28 }
  0x77   :  { %v52_v19 = vmul.f32 %v457_v16, %v35_v17  ;;  %v50_v20 = vmul.f32 %v457_v16, %v29_v18  ;;  %v42_v25 = vpop.xlane.xlu2 %41 }
  0x78   :  { %v54_v32 = vmul.f32 %v457_v16, %v42_v25 }
  0x79   :  { %v461_v21 = vsub.f32 %v23_v0, %v52_v19  ;;  %v463_v22 = vsub.f32 %v21_v1, %v50_v20 }
  0x7a   :  { %v478_v35 = vsub.f32 %v25_v4, %v54_v32 }
  0x7b   :  { %v62_v23 = vmul.f32 %v461_v21, %v461_v21  ;;  %v60_v24 = vmul.f32 %v463_v22, %v463_v22 }
  0x7c   :  { %v64_v40 = vmul.f32 %v478_v35, %v478_v35 }
  0x7d   :  { %v71_v26 = vsel %vm26_vm0, %v62_v23, 0.0  ;;  %v65_v27 = vsel %vm26_vm0, %v60_v24, 0.0  ;;  %v371_v23 = vld [vmem:[%s592_s3] ss:$0 sm:$0xff] }
  0x7e   :  { %72 = vadd.xlane.f32.xlu1 %v71_v26  ;;  %v38_v28 = vpop.xlane.xlu1 %37  ;;  %66 = vadd.xlane.f32.xlu2 %v65_v27  ;;  %v32_v29 = vpop.xlane.xlu0 %31  ;;  %v77_v41 = vsel %vm39_vm1, %v64_v40, 0.0 }
  0x7f   :  { %v53_v30 = vmul.f32 %v457_v16, %v38_v28  ;;  %v51_v31 = vmul.f32 %v457_v16, %v32_v29 }
  0x81   :  { %v474_v33 = vsub.f32 %v24_v6, %v53_v30  ;;  %v476_v34 = vsub.f32 %v22_v7, %v51_v31 }
  0x83   :  { %v63_v36 = vmul.f32 %v474_v33, %v474_v33  ;;  %v61_v37 = vmul.f32 %v476_v34, %v476_v34 }
  0x85   :  { %v74_v38 = vsel %vm26_vm0, %v63_v36, 0.0  ;;  %v68_v39 = vsel %vm26_vm0, %v61_v37, 0.0 }
  0x86   :  { %75 = vadd.xlane.f32.xlu2 %v74_v38  ;;  %69 = vadd.xlane.f32.xlu0 %v68_v39 }
  0x8e   :  { %78 = vadd.xlane.f32.xlu0 %v77_v41 }
  0xf1   :  { %v73_v43 = vpop.xlane.xlu1 %72  ;;  %v67_v44 = vpop.xlane.xlu2 %66 }
  0xf2   :  { %v82_v45 = vmul.f32 %v73_v43, %v457_v16  ;;  %v80_v46 = vmul.f32 %v67_v44, %v457_v16 }
  0xf4   :  { %v87_v47 = vadd.f32 1e-05, %v82_v45  ;;  %v85_v48 = vadd.f32 1e-05, %v80_v46 }
  0xf6   :  { %376 = vrsqrt.f32 %v87_v47  ;;  %vm116_vm3 = vweird.f32 %v87_v47  ;;  %vm96_vm7 = vweird.f32 %v85_v48 }
  0xf7   :  { %378 = vrsqrt.f32 %v85_v48 }
  0xf9   :  { %v76_v50 = vpop.xlane.xlu2 %75  ;;  %v70_v51 = vpop.xlane.xlu0 %69 }
  0xfa   :  { %v83_v52 = vmul.f32 %v76_v50, %v457_v16  ;;  %v81_v53 = vmul.f32 %v70_v51, %v457_v16  ;;  %v373_v51 = vld [vmem:[%s594_s2] ss:$0 sm:$0xff] }
  0xfc   :  { %v377_v54 = vpop.eup %376  ;;  %v88_v55 = vadd.f32 1e-05, %v83_v52  ;;  %v86_v56 = vadd.f32 1e-05, %v81_v53 }
  0xfd   :  { %v379_v57 = vpop.eup %378  ;;  %v111_v58 = vmul.f32 %v377_v54, %v87_v47  ;;  %vm117_vm4 = vweird.f32 %v377_v54 }
  0xfe   :  { %v91_v59 = vmul.f32 %v379_v57, %v85_v48  ;;  %380 = vrsqrt.f32 %v88_v55  ;;  %vm97_vm5 = vweird.f32 %v379_v57  ;;  %vm118_vm6 = vmor %vm116_vm3, %vm117_vm4  ;;  %vm126_vm9 = vweird.f32 %v88_v55 }
  0xff   :  { %v112_v60 = vmul.f32 %v377_v54, %v111_v58  ;;  %382 = vrsqrt.f32 %v86_v56  ;;  %vm98_vm8 = vmor %vm96_vm7, %vm97_vm5  ;;  %vm106_vm13 = vweird.f32 %v86_v56 }
 0x100   :  { %v92_v61 = vmul.f32 %v379_v57, %v91_v59 }
 0x101   :  { %v113_v62 = vmul.f32 0.5, %v112_v60  ;;  %v79_v63 = vpop.xlane.xlu0 %78 }
 0x102   :  { %v93_v0 = vmul.f32 0.5, %v92_v61  ;;  %v84_v1 = vmul.f32 %v79_v63, %v457_v16 }
 0x103   :  { %v114_v2 = vsub.f32 1.5, %v113_v62 }
 0x104   :  { %v381_v3 = vpop.eup %380  ;;  %v94_v4 = vsub.f32 1.5, %v93_v0  ;;  %v89_v5 = vadd.f32 1e-05, %v84_v1 }
 0x105   :  { %v383_v6 = vpop.eup %382  ;;  %v115_v7 = vmul.f32 %v377_v54, %v114_v2  ;;  %v121_v8 = vmul.f32 %v381_v3, %v88_v55  ;;  %vm127_vm10 = vweird.f32 %v381_v3 }
 0x106   :  { %v95_v9 = vmul.f32 %v379_v57, %v94_v4  ;;  %v101_v10 = vmul.f32 %v383_v6, %v86_v56  ;;  %384 = vrsqrt.f32 %v89_v5  ;;  %vm107_vm11 = vweird.f32 %v383_v6  ;;  %vm128_vm12 = vmor %vm126_vm9, %vm127_vm10 }
 0x107   :  { %v122_v11 = vmul.f32 %v381_v3, %v121_v8  ;;  %v119_v13 = vsel %vm118_vm6, %v377_v54, %v115_v7  ;;  %vm108_vm14 = vmor %vm106_vm13, %vm107_vm11  ;;  %vm136_vm1 = vweird.f32 %v89_v5 }
 0x108   :  { %v102_v12 = vmul.f32 %v383_v6, %v101_v10  ;;  %v99_v15 = vsel %vm98_vm8, %v379_v57, %v95_v9  ;;  %v142_v19 = vmul.f32 %v119_v13, %v461_v21  ;;  %v372_v21 = vld [vmem:[%s593_s4] ss:$0 sm:$0xff] }
 0x109   :  { %v123_v14 = vmul.f32 0.5, %v122_v11  ;;  %v140_v24 = vmul.f32 %v99_v15, %v463_v22 }
 0x10a   :  { %v103_v16 = vmul.f32 0.5, %v102_v12  ;;  %v151_v32 = vmul.f32 %v371_v23, %v142_v19 }
 0x10b   :  { %v124_v17 = vsub.f32 1.5, %v123_v14  ;;  %v149_v22 = vmul.f32 %v371_v23, %v140_v24 }
 0x10c   :  { %v385_v18 = vpop.eup %384  ;;  %v104_v20 = vsub.f32 1.5, %v103_v16  ;;  %v160_v41 = vadd.f32 %v372_v21, %v151_v32 }
 0x10d   :  { %v125_v25 = vmul.f32 %v381_v3, %v124_v17  ;;  %v131_v26 = vmul.f32 %v385_v18, %v89_v5  ;;  %vm137_vm15 = vweird.f32 %v385_v18  ;;  %v158_v44 = vadd.f32 %v372_v21, %v149_v22 }
 0x10e   :  { %v105_v27 = vmul.f32 %v383_v6, %v104_v20  ;;  %vm138_vm2 = vmor %vm136_vm1, %vm137_vm15 }
 0x10f   :  { %v129_v28 = vsel %vm128_vm12, %v381_v3, %v125_v25  ;;  %v132_v29 = vmul.f32 %v385_v18, %v131_v26 }
 0x110   :  { %v143_v30 = vmul.f32 %v129_v28, %v474_v33  ;;  %v109_v31 = vsel %vm108_vm14, %v383_v6, %v105_v27 }
 0x111   :  { %v141_v36 = vmul.f32 %v109_v31, %v476_v34  ;;  %v133_v37 = vmul.f32 0.5, %v132_v29 }
 0x112   :  { %v152_v38 = vmul.f32 %v371_v23, %v143_v30 }
 0x113   :  { %v134_v39 = vsub.f32 1.5, %v133_v37  ;;  %v150_v40 = vmul.f32 %v371_v23, %v141_v36 }
 0x114   :  { %v161_v42 = vadd.f32 %v372_v21, %v152_v38 }
 0x115   :  { %v135_v43 = vmul.f32 %v385_v18, %v134_v39  ;;  %v159_v33 = vadd.f32 %v372_v21, %v150_v40 }
 0x116   :  { %v164_v45 = vpack.c.bf16 %v161_v42, %v160_v41 }
 0x117   :  { %v139_v46 = vsel %vm138_vm2, %v385_v18, %v135_v43  ;;  %v163_v47 = vpack.c.bf16 %v159_v33, %v158_v44 }
 0x118   :  { %346 = vmatmul.msk.bf16.vlgmr.msra.gmra.mxu1 %vm26_vm0, %v164_v45  ;;  %v144_v34 = vmul.f32 %v139_v46, %v478_v35 }
 0x119   :  { %345 = vmatmul.msk.bf16.vlgmr.msra.gmra.mxu0 %vm26_vm0, %v163_v47 }
 0x11a   :  { %v153_v48 = vmul.f32 %v371_v23, %v144_v34 }
 0x11c   :  { %v162_v49 = vadd.f32 %v372_v21, %v153_v48 }
 0x11e   :  { %v165_v50 = vpack.c.bf16 %v162_v49, %v162_v49 }
 0x120   :  { %347 = vmatmul.msk.bf16.vlgmr.msra.gmra.mxu2 %vm26_vm0, %v165_v50 }
 0x195   :  { %v209_v52 = vpop.f32.mrf.mxu1 }
 0x196   :  { %v204_v53 = vpop.f32.mrf.mxu0  ;;  %v517_v54 = vadd.f32 %v373_v51, %v209_v52 }
 0x197   :  { %v519_v55 = vadd.f32 %v373_v51, %v204_v53 }
 0x198   :  { %v350_v56 = vmul.f32 -1.702, %v517_v54 }
 0x199   :  { %v348_v35 = vmul.f32 -1.702, %v519_v55 }
 0x19a   :  { %v232_v57 = vmul.f32 1.442695, %v350_v56 }
 0x19b   :  { %v228_v58 = vmul.f32 1.442695, %v348_v35 }
 0x19c   :  { %386 = vpow2.f32 %v232_v57 }
 0x19d   :  { %388 = vpow2.f32 %v228_v58  ;;  %v211_v59 = vpop.f32.mrf.mxu1 }
 0x19e   :  { %v206_v60 = vpop.f32.mrf.mxu0  ;;  %v523_v61 = vadd.f32 %v373_v51, %v211_v59 }
 0x19f   :  { %v525_v62 = vadd.f32 %v373_v51, %v206_v60 }
 0x1a0   :  { %v351_v63 = vmul.f32 -1.702, %v523_v61 }
 0x1a1   :  { %v349_v0 = vmul.f32 -1.702, %v525_v62 }
 0x1a2   :  { %v387_v1 = vpop.eup %386  ;;  %v234_v2 = vmul.f32 1.442695, %v351_v63 }
 0x1a3   :  { %v389_v3 = vpop.eup %388  ;;  %v240_v4 = vadd.f32 1.0, %v387_v1  ;;  %v230_v5 = vmul.f32 1.442695, %v349_v0  ;;  %v214_v6 = vpop.f32.mrf.mxu2 }
 0x1a4   :  { %v238_v7 = vadd.f32 1.0, %v389_v3  ;;  %390 = vpow2.f32 %v234_v2  ;;  %v529_v8 = vadd.f32 %v373_v51, %v214_v6 }
 0x1a5   :  { %392 = vrcp.f32 %v240_v4  ;;  %v282_v29 = vand.u32 2147483647, %v240_v4  ;;  %v284_v30 = vand.u32 2147483648, %v240_v4  ;;  %vm278_vm4 = vweird.f32 %v240_v4 }
 0x1a6   :  { %394 = vrcp.f32 %v238_v7  ;;  %v352_v9 = vmul.f32 -1.702, %v529_v8  ;;  %vm248_vm3 = vweird.f32 %v238_v7  ;;  %v252_v32 = vand.u32 2147483647, %v238_v7 }
 0x1a7   :  { %396 = vpow2.f32 %v230_v5  ;;  %v254_v36 = vand.u32 2147483648, %v238_v7  ;;  %vm545_vm7 = vcmp.eq.f32.partialorder %v282_v29, 8.507059e+37  ;;  %v285_v42 = vor.u32 1.1754944e-38, %v284_v30 }
 0x1a8   :  { %v236_v10 = vmul.f32 1.442695, %v352_v9  ;;  %vm556_vm10 = vcmp.eq.f32.partialorder %v252_v32, 8.507059e+37 }
 0x1a9   :  { %v255_v48 = vor.u32 1.1754944e-38, %v254_v36 }
 0x1aa   :  { %v391_v11 = vpop.eup %390  ;;  %398 = vpow2.f32 %v236_v10 }
 0x1ab   :  { %v393_v12 = vpop.eup %392  ;;  %v241_v13 = vadd.f32 1.0, %v391_v11  ;;  %v216_v14 = vpop.f32.mrf.mxu2 }
 0x1ac   :  { %v532_v15 = vpop.eup %394  ;;  %v274_v16 = vmul.f32 %v393_v12, %v240_v4  ;;  %vm279_vm0 = vweird.f32 %v393_v12 }
 0x1ad   :  { %v397_v17 = vpop.eup %396  ;;  %v244_v18 = vmul.f32 %v532_v15, %v238_v7  ;;  %400 = vrcp.f32 %v241_v13  ;;  %vm249_vm5 = vweird.f32 %v532_v15  ;;  %v299_v39 = vand.u32 2147483648, %v241_v13  ;;  %vm541_vm6 = vmor %vm278_vm4, %vm279_vm0 }
 0x1ae   :  { %v275_v19 = vsub.f32 1.0, %v274_v16  ;;  %v239_v20 = vadd.f32 1.0, %v397_v17  ;;  %v297_v44 = vand.u32 2147483647, %v241_v13  ;;  %vm552_vm9 = vmor %vm248_vm3, %vm249_vm5  ;;  %vm293_vm11 = vweird.f32 %v241_v13 }
 0x1af   :  { %v245_v23 = vsub.f32 1.0, %v244_v18  ;;  %v300_v56 = vor.u32 1.1754944e-38, %v299_v39 }
 0x1b0   :  { %v276_v24 = vmul.f32 %v393_v12, %v275_v19  ;;  %402 = vrcp.f32 %v239_v20  ;;  %v399_v25 = vpop.eup %398  ;;  %v267_v45 = vand.u32 2147483647, %v239_v20  ;;  %v269_v50 = vand.u32 2147483648, %v239_v20 }
 0x1b1   :  { %v246_v26 = vmul.f32 %v532_v15, %v245_v23  ;;  %v536_v27 = vadd.f32 1.0, %v399_v25  ;;  %vm263_vm14 = vweird.f32 %v239_v20  ;;  %vm298_vm1 = vcmp.eq.f32.partialorder %v297_v44, 8.507059e+37 }
 0x1b2   :  { %v277_v31 = vadd.f32 %v393_v12, %v276_v24  ;;  %vm566_vm15 = vcmp.eq.f32.partialorder %v267_v45, 8.507059e+37  ;;  %v270_v0 = vor.u32 1.1754944e-38, %v269_v50 }
 0x1b3   :  { %v401_v28 = vpop.eup %400  ;;  %404 = vrcp.f32 %v536_v27  ;;  %v247_v22 = vadd.f32 %v532_v15, %v246_v26  ;;  %v314_v6 = vand.u32 2147483648, %v536_v27  ;;  %v312_v10 = vand.u32 2147483647, %v536_v27 }
 0x1b4   :  { %v289_v21 = vmul.f32 %v401_v28, %v241_v13  ;;  %v281_v33 = vsel %vm541_vm6, %v393_v12, %v277_v31  ;;  %vm294_vm8 = vweird.f32 %v401_v28  ;;  %vm308_vm3 = vweird.f32 %v536_v27 }
 0x1b5   :  { %v251_v52 = vsel %vm552_vm9, %v532_v15, %v247_v22  ;;  %v286_v35 = vsel %vm545_vm7, %v285_v42, %v281_v33  ;;  %vm295_vm13 = vmor %vm293_vm11, %vm294_vm8  ;;  %vm313_vm5 = vcmp.eq.f32.partialorder %v312_v10, 8.507059e+37 }
 0x1b6   :  { %v403_v37 = vpop.eup %402  ;;  %v290_v38 = vsub.f32 1.0, %v289_v21  ;;  %v256_v3 = vsel %vm556_vm10, %v255_v48, %v251_v52  ;;  %v320_v4 = vmul.f32 %v286_v35, %v517_v54  ;;  %v315_v54 = vor.u32 1.1754944e-38, %v314_v6 }
 0x1b7   :  { %v259_v43 = vmul.f32 %v403_v37, %v239_v20  ;;  %vm264_vm12 = vweird.f32 %v403_v37  ;;  %v318_v13 = vmul.f32 %v256_v3, %v519_v55 }
 0x1b8   :  { %v291_v46 = vmul.f32 %v401_v28, %v290_v38  ;;  %vm265_vm2 = vmor %vm263_vm14, %vm264_vm12 }
 0x1b9   :  { %v260_v49 = vsub.f32 1.0, %v259_v43  ;;  %v405_v51 = vpop.eup %404 }
 0x1ba   :  { %v292_v53 = vadd.f32 %v401_v28, %v291_v46  ;;  %v304_v58 = vmul.f32 %v405_v51, %v536_v27  ;;  %vm309_vm0 = vweird.f32 %v405_v51 }
 0x1bb   :  { %v261_v57 = vmul.f32 %v403_v37, %v260_v49  ;;  %vm310_vm4 = vmor %vm308_vm3, %vm309_vm0 }
 0x1bc   :  { %v296_v60 = vsel %vm295_vm13, %v401_v28, %v292_v53  ;;  %v305_v2 = vsub.f32 1.0, %v304_v58 }
 0x1bd   :  { %v262_v63 = vadd.f32 %v403_v37, %v261_v57  ;;  %v301_v1 = vsel %vm298_vm1, %v300_v56, %v296_v60 }
 0x1be   :  { %v321_v5 = vmul.f32 %v301_v1, %v523_v61  ;;  %v306_v9 = vmul.f32 %v405_v51, %v305_v2 }
 0x1bf   :  { %v266_v7 = vsel %vm265_vm2, %v403_v37, %v262_v63 }
 0x1c0   :  { %v271_v11 = vsel %vm566_vm15, %v270_v0, %v266_v7  ;;  %v363_v12 = vpack.c.bf16 %v321_v5, %v320_v4  ;;  %v307_v15 = vadd.f32 %v405_v51, %v306_v9 }
 0x1c1   :  { %v319_v14 = vmul.f32 %v271_v11, %v525_v62 }
 0x1c2   :  { %365 = vst [vmem:[%s596_s5 + $0x8] sm:$0xff] %v363_v12   ;;  %v311_v16 = vsel %vm310_vm4, %v405_v51, %v307_v15 }
 0x1c3   :  { %v358_v61 = vpack.c.bf16 %v319_v14, %v318_v13  ;;  %v316_v17 = vsel %vm313_vm5, %v315_v54, %v311_v16 }
 0x1c4   :  { %v322_v55 = vmul.f32 %v316_v17, %v529_v8 }
 0x1c5   :  { %359 = vst [vmem:[%s596_s5] sm:$0xff] %v358_v61  }
 0x1c6   :  { %v327_v62 = vpack.c.bf16 %v322_v55, %v322_v55 }
 0x1c8   :  { %332 = vst [vmem:[%s596_s5 + $0x10] sm:$0x1] %v327_v62 }

// kernel: _lambda_.23
= control target key start
LH: loop header
LB: loop body
LE: loop exit
PB: predicated region body
PF: predicated region fallthrough
CT: control target
= control target key end

     0   :  { %vm139_vm0 = vcmask 261120   ;;  %vm144_vm1 = vcmask 254976   ;;  %s312_s1 = inlined_call_operand.vmem [shape: bf16[128,32], index: 1, kind: input, shape index: {}]   ;;  %s313_s2 = inlined_call_operand.vmem [shape: f32[1,32], index: 2, kind: input, shape index: {}]   ;;  %s314_s0 = inlined_call_operand.vmem [shape: bf16[34,128], index: 0, kind: input, shape index: {}]   ;;  %s315_s3 = inlined_call_operand.vmem [shape: f32[34,32], index: 3, kind: input, shape index: {}]   ;;  %s316_s4 = inlined_call_operand.vmem [shape: f32[34,32], index: 4, kind: output, shape index: {}]  }
   0x1   :  { %v199_v0 = vld [vmem:[%s312_s1 + $0x38] sm:$0xff]  ;;  %v198_v1 = vld [vmem:[%s312_s1 + $0x30] sm:$0xff]  ;;  %v197_v2 = vld [vmem:[%s312_s1 + $0x28] sm:$0xff] }
   0x2   :  { %106 = vmatpush.bf16.msra.mxu0 %v199_v0  ;;  %200 = vmatpush.bf16.msra.mxu1 %v199_v0  ;;  %v196_v3 = vld [vmem:[%s312_s1 + $0x20] sm:$0xff]  ;;  %v195_v4 = vld [vmem:[%s312_s1 + $0x18] sm:$0xff]  ;;  %v194_v5 = vld [vmem:[%s312_s1 + $0x10] sm:$0xff] }
   0x3   :  { %201 = vmatpush.bf16.msra.mxu2 %v199_v0  ;;  %v193_v6 = vld [vmem:[%s312_s1 + $0x8] sm:$0xff]  ;;  %v21_v7 = vld [vmem:[%s314_s0 + $0x10] sm:$0x1]  ;;  %v192_v8 = vld [vmem:[%s312_s1] sm:$0xff] }
   0x4   :  { %v51_v9 = vunpack.c.l.b16 %v21_v7  ;;  %v190_v10 = vld [vmem:[%s314_s0] sm:$0xff]  ;;  %v191_v11 = vld [vmem:[%s314_s0 + $0x8] sm:$0xff]  ;;  %v131_v17 = vld [vmem:[%s315_s3 + $0x10] sm:$0xff] }
   0x5   :  { %v216_v13 = vld [vmem:[%s313_s2] ss:$0 sm:$0xff]  ;;  %v130_v26 = vld [vmem:[%s315_s3 + $0x8] sm:$0xff]  ;;  %v132_v28 = vld [vmem:[%s315_s3 + $0x18] sm:$0xff] }
   0x6   :  { %107 = vmatpush.bf16.msra.mxu0 %v198_v1  ;;  %202 = vmatpush.bf16.msra.mxu1 %v198_v1  ;;  %v54_v12 = vpack.c.b16 %v51_v9, %v51_v9  ;;  %v129_v15 = vld [vmem:[%s315_s3] sm:$0xff] }
   0x7   :  { %203 = vmatpush.bf16.msra.mxu2 %v198_v1  ;;  %v133_v23 = vld [vmem:[%s315_s3 + $0x20] sm:$0x3] }
   0xa   :  { %108 = vmatpush.bf16.msra.mxu0 %v197_v2  ;;  %204 = vmatpush.bf16.msra.mxu1 %v197_v2 }
   0xb   :  { %205 = vmatpush.bf16.msra.mxu2 %v197_v2 }
   0xe   :  { %109 = vmatpush.bf16.msra.mxu0 %v196_v3  ;;  %206 = vmatpush.bf16.msra.mxu1 %v196_v3 }
   0xf   :  { %207 = vmatpush.bf16.msra.mxu2 %v196_v3 }
  0x12   :  { %110 = vmatpush.bf16.msra.mxu0 %v195_v4  ;;  %208 = vmatpush.bf16.msra.mxu1 %v195_v4 }
  0x13   :  { %209 = vmatpush.bf16.msra.mxu2 %v195_v4 }
  0x16   :  { %111 = vmatpush.bf16.msra.mxu0 %v194_v5  ;;  %210 = vmatpush.bf16.msra.mxu1 %v194_v5 }
  0x17   :  { %211 = vmatpush.bf16.msra.mxu2 %v194_v5 }
  0x1a   :  { %112 = vmatpush.bf16.msra.mxu0 %v193_v6  ;;  %212 = vmatpush.bf16.msra.mxu1 %v193_v6 }
  0x1b   :  { %213 = vmatpush.bf16.msra.mxu2 %v193_v6 }
  0x1e   :  { %113 = vmatpush.bf16.msra.mxu0 %v192_v8  ;;  %214 = vmatpush.bf16.msra.mxu1 %v192_v8 }
  0x1f   :  { %215 = vmatpush.bf16.msra.mxu2 %v192_v8 }
  0x21   :  { %114 = vmatmul.bf16.vlgmr.msra.gmra.mxu0 %v190_v10  ;;  %119 = vmatmul.bf16.vlgmr.msra.gmra.mxu1 %v191_v11 }
  0x22   :  { %124 = vmatmul.bf16.vlgmr.msra.gmra.mxu2 %v54_v12 }
  0x9e   :  { %v115_v14 = vpop.f32.mrf.mxu0  ;;  %v120_v16 = vpop.f32.mrf.mxu1 }
  0x9f   :  { %v116_v18 = vadd.f32 %v216_v13, %v115_v14  ;;  %v121_v19 = vadd.f32 %v216_v13, %v120_v16 }
  0xa1   :  { %v134_v20 = vadd.f32 %v129_v15, %v116_v18  ;;  %v136_v21 = vadd.f32 %v131_v17, %v121_v19 }
  0xa3   :  { %140 = vst.msk [vmem:[%s316_s4] sm:$0xff] %vm139_vm0, %v134_v20 }
  0xa4   :  { %142 = vst.msk [vmem:[%s316_s4 + $0x10] sm:$0xff] %vm139_vm0, %v136_v21 }
  0xa5   :  { %v125_v22 = vpop.f32.mrf.mxu2 }
  0xa6   :  { %v126_v24 = vadd.f32 %v216_v13, %v125_v22  ;;  %v117_v25 = vpop.f32.mrf.mxu0  ;;  %v122_v27 = vpop.f32.mrf.mxu1 }
  0xa7   :  { %v118_v29 = vadd.f32 %v216_v13, %v117_v25  ;;  %v123_v30 = vadd.f32 %v216_v13, %v122_v27 }
  0xa8   :  { %v138_v31 = vadd.f32 %v133_v23, %v126_v24 }
  0xa9   :  { %v135_v32 = vadd.f32 %v130_v26, %v118_v29  ;;  %v137_v33 = vadd.f32 %v132_v28, %v123_v30 }
  0xaa   :  { %145 = vst.msk [vmem:[%s316_s4 + $0x20] sm:$0x3] %vm144_vm1, %v138_v31 }
  0xab   :  { %141 = vst.msk [vmem:[%s316_s4 + $0x8] sm:$0xff] %vm139_vm0, %v135_v32 }
  0xac   :  { %143 = vst.msk [vmem:[%s316_s4 + $0x18] sm:$0xff] %vm139_vm0, %v137_v33 }
  0xad   :  { %v127_v34 = vpop.f32.mrf.mxu2 }

</bundles_post_ra>
